<compile_context>
chip_gen: v5e
topology: v5e:2x2
jax: 0.10.0
libtpu: 0.0.40
codegen_flags: <defaults>
</compile_context>

<pallas_src>
import math
import functools

import jax
import jax.numpy as jnp
from jax import lax
from jax.experimental import pallas as pl
from jax.experimental.pallas import tpu as pltpu


MATMUL_DTYPE = jnp.bfloat16    # MXU operand dtype; accumulation stays f32.
_NEG_INF = -1e30               # finite additive mask value (exp underflows to 0)


# ------------------------------------------------------------------ kernels

def decoder_stack_kernel(x_ref, wa_ref, wf2_ref, vec_ref, out_ref,
                         x_sc, mask_sc, *, n_heads, d_head, d_ffn, ln_eps):
    """Fused decoder stack.  grid = (batch_split, layer); the layer axis is
    sequential, the running activation lives in VMEM scratch `x_sc` and the
    additive causal mask in `mask_sc` (built once at layer 0)."""
    layer = pl.program_id(1)
    n_layers = pl.num_programs(1)

    BT, L, D = x_sc.shape
    H, dh, F = n_heads, d_head, d_ffn
    N = BT * L

    @pl.when(layer == 0)
    def _():
        x_sc[...] = x_ref[...]                                   # (BT, L, D) f32
        row = lax.broadcasted_iota(jnp.int32, (L, L), 0)
        col = lax.broadcasted_iota(jnp.int32, (L, L), 1)
        mask_sc[...] = jnp.where(row >= col, 0.0, _NEG_INF)      # additive mask

    x2 = x_sc[...].reshape(N, D)                                 # (B*L rows, D) f32

    def mm(a, w):                                                # bf16 MXU, f32 acc
        return jnp.dot(a.astype(MATMUL_DTYPE), w,
                       preferred_element_type=jnp.float32)

    # ---- packed per-layer parameters (all lane-aligned slices) ----
    w_qkv = wa_ref[0, :, 0:3 * D]              # (D, 3D) bf16
    w_o   = wa_ref[0, :, 3 * D:4 * D]          # (D, D)  bf16
    w_f1  = wa_ref[0, :, 4 * D:4 * D + F]      # (D, F)  bf16
    w_f2  = wf2_ref[0]                         # (F, D)  bf16

    def vrow(r, width=D):                      # (1, width) f32 bias / LN row
        return vec_ref[0, r:r + 1, 0:width]

    b_q, b_k, b_v, b_o = vrow(0), vrow(1), vrow(2), vrow(3)
    b_f1 = vrow(4, F)
    b_f2 = vrow(5)
    ln1a, ln1b, ln2a, ln2b = vrow(6), vrow(7), vrow(8), vrow(9)

    # ---- fused QKV projection: one K=D matmul on B*L rows ----
    qkv = mm(x2, w_qkv)                                          # (N, 3D) f32
    q = (qkv[:, 0:D] + b_q) * (1.0 / math.sqrt(dh))              # scale folded into q
    k = qkv[:, D:2 * D] + b_k
    v = qkv[:, 2 * D:3 * D] + b_v

    # ---- attention: per batch element (tiny static loop), all heads batched ----
    ctx_rows = []
    for b in range(BT):
        sl = slice(b * L, (b + 1) * L)
        qh = jnp.swapaxes(q[sl].reshape(L, H, dh), 0, 1).astype(MATMUL_DTYPE)
        kh = jnp.swapaxes(k[sl].reshape(L, H, dh), 0, 1).astype(MATMUL_DTYPE)
        vh = jnp.swapaxes(v[sl].reshape(L, H, dh), 0, 1).astype(MATMUL_DTYPE)

        s = jnp.einsum('hqd,hkd->hqk', qh, kh,
                       preferred_element_type=jnp.float32)       # (H, L, L)
        s = s + mask_sc[...]                                     # additive causal mask
        s = s - jnp.max(s, axis=-1, keepdims=True)
        p = jnp.exp(s)
        # approx reciprocal (EUP): rows sum to 1 only to ~1e-3 rel. accuracy.
        p = p * pl.reciprocal(jnp.sum(p, axis=-1, keepdims=True), approx=True)

        o = jnp.einsum('hqk,hkd->hqd', p.astype(MATMUL_DTYPE), vh,
                       preferred_element_type=jnp.float32)       # (H, L, dh)
        ctx_rows.append(jnp.swapaxes(o, 0, 1).reshape(L, D))     # (L, D) merged heads
    ctx = ctx_rows[0] if BT == 1 else jnp.concatenate(ctx_rows, axis=0)   # (N, D)

    # ---- output projection: ONE merged K=D matmul ----
    attn_out = mm(ctx, w_o) + b_o                                # (N, D)

    def layernorm(y, a, bshift):
        # matches the reference: torch.std (unbiased /(D-1)), eps added to std
        mean = jnp.mean(y, axis=-1, keepdims=True)
        cen = y - mean
        var = jnp.sum(cen * cen, axis=-1, keepdims=True) * (1.0 / (D - 1))
        inv = 1.0 / (jnp.sqrt(var) + ln_eps)                     # exact reciprocal
        return cen * inv * a + bshift

    h1 = layernorm(x2 + attn_out, ln1a, ln1b)

    # ---- MLP ----
    ff = jnp.maximum(mm(h1, w_f1) + b_f1, 0.0)
    ff = mm(ff, w_f2) + b_f2

    h2 = layernorm(h1 + ff, ln2a, ln2b)
    x_sc[...] = h2.reshape(BT, L, D)                             # carry to next layer

    @pl.when(layer == n_layers - 1)
    def _():
        out_ref[...] = h2.reshape(BT, L, D)


def unembed_kernel(x_ref, wu_ref, bu_ref, out_ref):
    """logits = x @ W_U + b_U for one vocab tile (x stays VMEM-resident)."""
    out_ref[...] = (jnp.dot(x_ref[...], wu_ref[...],
                            preferred_element_type=jnp.float32) + bu_ref[...])


# ------------------------------------------------------------------ wrappers

def decoder_stack(x, w_a, w_f2, vecs, *, n_heads, d_head, d_ffn, ln_eps,
                  batch_split=None):
    B, L, D = x.shape
    n_layers = w_a.shape[0]
    if batch_split is None:
        batch_split = 2 if (B % 2 == 0 and B >= 2) else 1       # v7x: 2 TCs/chip
    assert B % batch_split == 0
    BT = B // batch_split
    WA = w_a.shape[2]
    F = d_ffn
    NR = vecs.shape[1]

    kernel = functools.partial(decoder_stack_kernel, n_heads=n_heads,
                               d_head=d_head, d_ffn=d_ffn, ln_eps=ln_eps)

    return pl.pallas_call(
        kernel,
        out_shape=jax.ShapeDtypeStruct((B, L, D), jnp.float32),
        grid=(batch_split, n_layers),
        in_specs=[
            pl.BlockSpec((BT, L, D), lambda i, l: (i, 0, 0)),    # activations
            pl.BlockSpec((1, D, WA), lambda i, l: (l, 0, 0)),    # W_qkv|W_O|W_f1
            pl.BlockSpec((1, F, D), lambda i, l: (l, 0, 0)),     # W_f2
            pl.BlockSpec((1, NR, F), lambda i, l: (l, 0, 0)),    # biases + LN
        ],
        out_specs=pl.BlockSpec((BT, L, D), lambda i, l: (i, 0, 0)),
        scratch_shapes=[pltpu.VMEM((BT, L, D), jnp.float32),     # running activation
                        pltpu.VMEM((L, L), jnp.float32)],        # additive causal mask
        compiler_params=pltpu.CompilerParams(
            dimension_semantics=("parallel", "arbitrary"),
            vmem_limit_bytes=32 * 1024 * 1024),
    )(x, w_a, w_f2, vecs)


def _vocab_tile(V):
    """Largest lane-dense tile (<=2048, multiple of 128) that divides V."""
    if V % 128 != 0:
        return V
    tn = 128
    while tn * 2 <= min(V, 2048) and V % (tn * 2) == 0:
        tn *= 2
    return tn


def unembed(x2d_bf16, w_u, b_u):
    N, D = x2d_bf16.shape
    V = w_u.shape[1]
    tn = _vocab_tile(V)
    return pl.pallas_call(
        unembed_kernel,
        out_shape=jax.ShapeDtypeStruct((N, V), jnp.float32),
        grid=(V // tn,),
        in_specs=[pl.BlockSpec((N, D), lambda j: (0, 0)),        # resident activations
                  pl.BlockSpec((D, tn), lambda j: (0, j)),       # W_U streamed once
                  pl.BlockSpec((1, tn), lambda j: (0, j))],
        out_specs=pl.BlockSpec((N, tn), lambda j: (0, j)),
        compiler_params=pltpu.CompilerParams(
            dimension_semantics=("parallel",),
            vmem_limit_bytes=32 * 1024 * 1024),
    )(x2d_bf16, w_u, b_u)


# ------------------------------------------------------------------ params

def xavier(key, shape, fan_in, fan_out):
    limit = math.sqrt(6.0 / (fan_in + fan_out))
    return jax.random.uniform(key, shape, jnp.float32, -limit, limit)


def linear_bias(key, shape, fan_in):
    bound = 1.0 / math.sqrt(fan_in)
    return jax.random.uniform(key, shape, jnp.float32, -bound, bound)


def init_params(key, *, vocab, d_model, d_ffn, n_heads, n_layers):
    D, F, V = d_model, d_ffn, vocab
    keys = iter(jax.random.split(key, 3 + 8 * n_layers))

    W_E = xavier(next(keys), (V, D), D, V)                       # f32 embedding table
    W_U = xavier(next(keys), (D, V), D, V).astype(MATMUL_DTYPE)  # stored [in, out]
    b_U = linear_bias(next(keys), (1, V), D)

    wa_layers, wf2_layers, vec_layers = [], [], []
    for _ in range(n_layers):
        W_qkv = xavier(next(keys), (D, 3 * D), D, 3 * D)
        W_o = xavier(next(keys), (D, D), D, D)
        W_f1 = xavier(next(keys), (D, F), D, F)
        W_f2 = xavier(next(keys), (F, D), F, D)
        b_qkv = linear_bias(next(keys), (3 * D,), D)
        b_o = linear_bias(next(keys), (D,), D)
        b_f1 = linear_bias(next(keys), (F,), D)
        b_f2 = linear_bias(next(keys), (D,), F)

        # bf16 weight slab: [W_qkv | W_O | W_f1]  -> one DMA per layer step
        wa_layers.append(jnp.concatenate([W_qkv, W_o, W_f1],
                                         axis=1).astype(MATMUL_DTYPE))
        wf2_layers.append(W_f2.astype(MATMUL_DTYPE))

        # f32 bias / LN slab, row layout:
        # 0:b_q 1:b_k 2:b_v 3:b_o 4:b_f1(width F) 5:b_f2 6:ln1a 7:ln1b 8:ln2a 9:ln2b
        vec = jnp.zeros((10, F), jnp.float32)
        vec = vec.at[0, :D].set(b_qkv[0:D])
        vec = vec.at[1, :D].set(b_qkv[D:2 * D])
        vec = vec.at[2, :D].set(b_qkv[2 * D:3 * D])
        vec = vec.at[3, :D].set(b_o)
        vec = vec.at[4, :F].set(b_f1)
        vec = vec.at[5, :D].set(b_f2)
        vec = vec.at[6, :D].set(jnp.ones((D,), jnp.float32))     # ln1 a
        vec = vec.at[8, :D].set(jnp.ones((D,), jnp.float32))     # ln2 a
        vec_layers.append(vec)

    return (W_E, W_U, b_U,
            jnp.stack(wa_layers, axis=0),
            jnp.stack(wf2_layers, axis=0),
            jnp.stack(vec_layers, axis=0))


def sinusoidal_pe(max_len, d_model):
    position = jnp.arange(max_len, dtype=jnp.float32)[:, None]
    div_term = jnp.exp(jnp.arange(0, d_model, 2, dtype=jnp.float32)
                       * -(math.log(10000.0) / d_model))
    pe = jnp.zeros((max_len, d_model), jnp.float32)
    pe = pe.at[:, 0::2].set(jnp.sin(position * div_term))
    pe = pe.at[:, 1::2].set(jnp.cos(position * div_term))
    return pe


# ------------------------------------------------------------------ model

def transformer_forward(tokens, W_E, W_U, b_U, w_a, w_f2, vecs, pe,
                        *, n_heads, d_head, d_ffn, ln_eps):
    B, L = tokens.shape
    # glue: embedding gather + positional encoding add (plain JAX)
    x = jnp.take(W_E, tokens, axis=0) + pe[:L][None]
    x = decoder_stack(x, w_a, w_f2, vecs, n_heads=n_heads, d_head=d_head,
                      d_ffn=d_ffn, ln_eps=ln_eps)
    x2 = x.reshape(B * L, -1).astype(MATMUL_DTYPE)   # cast once for unembed
    logits = unembed(x2, W_U, b_U)
    return logits.reshape(B, L, -1)


# ------------------------------------------------------------------ main

if __name__ == "__main__":
    # Small, lane-dense config consistent with TransformerConfig
    # (vocab=128 matches the dataclass default; d_ffn % d_model == 0).
    B, L = 2, 8
    VOCAB, D_MODEL, D_FFN, H, N_LAYERS = 128, 128, 256, 4, 2
    D_HEAD = D_MODEL // H
    LN_EPS = 1e-6

    key = jax.random.PRNGKey(0)
    k_params, k_tok = jax.random.split(key)

    W_E, W_U, b_U, w_a, w_f2, vecs = init_params(
        k_params, vocab=VOCAB, d_model=D_MODEL, d_ffn=D_FFN,
        n_heads=H, n_layers=N_LAYERS)
    pe = sinusoidal_pe(64, D_MODEL)
    tokens = jax.random.randint(k_tok, (B, L), 0, VOCAB)

    fwd = jax.jit(functools.partial(transformer_forward,
                                    n_heads=H, d_head=D_HEAD,
                                    d_ffn=D_FFN, ln_eps=LN_EPS))
    logits = fwd(tokens, W_E, W_U, b_U, w_a, w_f2, vecs, pe)
    jax.block_until_ready(logits)

    assert logits.shape == (B, L, VOCAB)
    assert bool(jnp.all(jnp.isfinite(logits)))
    print("KERNEL_OK")
</pallas_src>

<mosaic_0001>
module attributes {stable_mosaic.version = 11 : i64} {
  func.func @decoder_stack_kernel(%arg0: i32, %arg1: i32, %arg2: memref<1x8x128xf32, #tpu.memory_space<vmem>>, %arg3: memref<1x128x768xbf16, #tpu.memory_space<vmem>>, %arg4: memref<1x256x128xbf16, #tpu.memory_space<vmem>>, %arg5: memref<1x10x256xf32, #tpu.memory_space<vmem>>, %arg6: memref<1x8x128xf32, #tpu.memory_space<vmem>>, %arg7: memref<1x8x128xf32, #tpu.memory_space<vmem>>, %arg8: memref<8x8xf32, #tpu.memory_space<vmem>>) attributes {dimension_semantics = [#tpu.dimension_semantics<parallel>, #tpu.dimension_semantics<arbitrary>], iteration_bounds = array<i64: 2, 2>, scalar_prefetch = 0 : i64, scratch_operands = 2 : i64, tpu.core_type = #tpu.core_type<tc>, window_params = [{transform_indices = @transform_0, window_bounds = array<i64: 1, 8, 128>}, {transform_indices = @transform_1, window_bounds = array<i64: 1, 128, 768>}, {transform_indices = @transform_2, window_bounds = array<i64: 1, 256, 128>}, {transform_indices = @transform_3, window_bounds = array<i64: 1, 10, 256>}, {transform_indices = @transform_4, window_bounds = array<i64: 1, 8, 128>}]} {
    %c0_i32 = arith.constant 0 : i32
    %0 = arith.cmpi eq, %arg1, %c0_i32 : i32
    %1 = arith.extui %0 : i1 to i32
    %c0_i32_0 = arith.constant 0 : i32
    %2 = arith.cmpi ne, %1, %c0_i32_0 : i32
    scf.if %2 {
      %c0_61 = arith.constant 0 : index
      %c0_62 = arith.constant 0 : index
      %c0_63 = arith.constant 0 : index
      %139 = vector.load %arg2[%c0_61, %c0_62, %c0_63] : memref<1x8x128xf32, #tpu.memory_space<vmem>>, vector<1x8x128xf32>
      %c0_64 = arith.constant 0 : index
      %c0_65 = arith.constant 0 : index
      %c0_66 = arith.constant 0 : index
      %140 = vector.load %arg7[%c0_64, %c0_65, %c0_66] : memref<1x8x128xf32, #tpu.memory_space<vmem>>, vector<1x8x128xf32>
      tpu.vector_store %arg7[%c0_64, %c0_65, %c0_66], %139 {strides = array<i32>} : memref<1x8x128xf32, #tpu.memory_space<vmem>>, vector<1x8x128xf32>,
      %141 = tpu.iota {dimensions = array<i32: 0>} : vector<8x8xi32>
      %142 = tpu.iota {dimensions = array<i32: 1>} : vector<8x8xi32>
      %143 = arith.cmpi sge, %141, %142 : vector<8x8xi32>
      %cst_67 = arith.constant 0.000000e+00 : f32
      %cst_68 = arith.constant -1.000000e+30 : f32
      %144 = vector.broadcast %cst_67 : f32 to vector<8x8xf32>
      %145 = vector.broadcast %cst_68 : f32 to vector<8x8xf32>
      %146 = arith.select %143, %144, %145 : vector<8x8xi1>, vector<8x8xf32>
      %c0_69 = arith.constant 0 : index
      %c0_70 = arith.constant 0 : index
      %147 = vector.load %arg8[%c0_69, %c0_70] : memref<8x8xf32, #tpu.memory_space<vmem>>, vector<8x8xf32>
      tpu.vector_store %arg8[%c0_69, %c0_70], %146 {strides = array<i32>} : memref<8x8xf32, #tpu.memory_space<vmem>>, vector<8x8xf32>,
    } else {
    }
    %c0 = arith.constant 0 : index
    %c0_1 = arith.constant 0 : index
    %c0_2 = arith.constant 0 : index
    %3 = vector.load %arg7[%c0, %c0_1, %c0_2] : memref<1x8x128xf32, #tpu.memory_space<vmem>>, vector<1x8x128xf32>
    %4 = vector.shape_cast %3 : vector<1x8x128xf32> to vector<8x128xf32>
    %c0_3 = arith.constant 0 : index
    %c0_4 = arith.constant 0 : index
    %c0_5 = arith.constant 0 : index
    %5 = vector.load %arg3[%c0_3, %c0_4, %c0_5] : memref<1x128x768xbf16, #tpu.memory_space<vmem>>, vector<1x128x384xbf16>
    %6 = vector.shape_cast %5 : vector<1x128x384xbf16> to vector<128x384xbf16>
    %c0_6 = arith.constant 0 : index
    %c0_7 = arith.constant 0 : index
    %c384 = arith.constant 384 : index
    %7 = vector.load %arg3[%c0_6, %c0_7, %c384] : memref<1x128x768xbf16, #tpu.memory_space<vmem>>, vector<1x128x128xbf16>
    %8 = vector.shape_cast %7 : vector<1x128x128xbf16> to vector<128x128xbf16>
    %c0_8 = arith.constant 0 : index
    %c0_9 = arith.constant 0 : index
    %c512 = arith.constant 512 : index
    %9 = vector.load %arg3[%c0_8, %c0_9, %c512] : memref<1x128x768xbf16, #tpu.memory_space<vmem>>, vector<1x128x256xbf16>
    %10 = vector.shape_cast %9 : vector<1x128x256xbf16> to vector<128x256xbf16>
    %c0_10 = arith.constant 0 : index
    %c0_11 = arith.constant 0 : index
    %c0_12 = arith.constant 0 : index
    %11 = vector.load %arg4[%c0_10, %c0_11, %c0_12] : memref<1x256x128xbf16, #tpu.memory_space<vmem>>, vector<1x256x128xbf16>
    %12 = vector.shape_cast %11 : vector<1x256x128xbf16> to vector<256x128xbf16>
    %c0_13 = arith.constant 0 : index
    %c0_14 = arith.constant 0 : index
    %c0_15 = arith.constant 0 : index
    %13 = vector.load %arg5[%c0_13, %c0_14, %c0_15] : memref<1x10x256xf32, #tpu.memory_space<vmem>>, vector<1x1x128xf32>
    %14 = vector.shape_cast %13 : vector<1x1x128xf32> to vector<1x128xf32>
    %c0_16 = arith.constant 0 : index
    %c1 = arith.constant 1 : index
    %c0_17 = arith.constant 0 : index
    %15 = vector.load %arg5[%c0_16, %c1, %c0_17] : memref<1x10x256xf32, #tpu.memory_space<vmem>>, vector<1x1x128xf32>
    %16 = vector.shape_cast %15 : vector<1x1x128xf32> to vector<1x128xf32>
    %c0_18 = arith.constant 0 : index
    %c2 = arith.constant 2 : index
    %c0_19 = arith.constant 0 : index
    %17 = vector.load %arg5[%c0_18, %c2, %c0_19] : memref<1x10x256xf32, #tpu.memory_space<vmem>>, vector<1x1x128xf32>
    %18 = vector.shape_cast %17 : vector<1x1x128xf32> to vector<1x128xf32>
    %c0_20 = arith.constant 0 : index
    %c3 = arith.constant 3 : index
    %c0_21 = arith.constant 0 : index
    %19 = vector.load %arg5[%c0_20, %c3, %c0_21] : memref<1x10x256xf32, #tpu.memory_space<vmem>>, vector<1x1x128xf32>
    %20 = vector.shape_cast %19 : vector<1x1x128xf32> to vector<1x128xf32>
    %c0_22 = arith.constant 0 : index
    %c4 = arith.constant 4 : index
    %c0_23 = arith.constant 0 : index
    %21 = vector.load %arg5[%c0_22, %c4, %c0_23] : memref<1x10x256xf32, #tpu.memory_space<vmem>>, vector<1x1x256xf32>
    %22 = vector.shape_cast %21 : vector<1x1x256xf32> to vector<1x256xf32>
    %c0_24 = arith.constant 0 : index
    %c5 = arith.constant 5 : index
    %c0_25 = arith.constant 0 : index
    %23 = vector.load %arg5[%c0_24, %c5, %c0_25] : memref<1x10x256xf32, #tpu.memory_space<vmem>>, vector<1x1x128xf32>
    %24 = vector.shape_cast %23 : vector<1x1x128xf32> to vector<1x128xf32>
    %c0_26 = arith.constant 0 : index
    %c6 = arith.constant 6 : index
    %c0_27 = arith.constant 0 : index
    %25 = vector.load %arg5[%c0_26, %c6, %c0_27] : memref<1x10x256xf32, #tpu.memory_space<vmem>>, vector<1x1x128xf32>
    %26 = vector.shape_cast %25 : vector<1x1x128xf32> to vector<1x128xf32>
    %c0_28 = arith.constant 0 : index
    %c7 = arith.constant 7 : index
    %c0_29 = arith.constant 0 : index
    %27 = vector.load %arg5[%c0_28, %c7, %c0_29] : memref<1x10x256xf32, #tpu.memory_space<vmem>>, vector<1x1x128xf32>
    %28 = vector.shape_cast %27 : vector<1x1x128xf32> to vector<1x128xf32>
    %c0_30 = arith.constant 0 : index
    %c8 = arith.constant 8 : index
    %c0_31 = arith.constant 0 : index
    %29 = vector.load %arg5[%c0_30, %c8, %c0_31] : memref<1x10x256xf32, #tpu.memory_space<vmem>>, vector<1x1x128xf32>
    %30 = vector.shape_cast %29 : vector<1x1x128xf32> to vector<1x128xf32>
    %c0_32 = arith.constant 0 : index
    %c9 = arith.constant 9 : index
    %c0_33 = arith.constant 0 : index
    %31 = vector.load %arg5[%c0_32, %c9, %c0_33] : memref<1x10x256xf32, #tpu.memory_space<vmem>>, vector<1x1x128xf32>
    %32 = vector.shape_cast %31 : vector<1x1x128xf32> to vector<1x128xf32>
    %33 = arith.truncf %4 : vector<8x128xf32> to vector<8x128xbf16>
    %cst = arith.constant dense<0.000000e+00> : vector<8x384xf32>
    %34 = tpu.matmul %33, %6, %cst {dimension_numbers = #tpu.dot_dimension_numbers<[1], [0], [0], [1], [0, 0, 1, 1], [], []>} : vector<8x128xbf16>, vector<128x384xbf16>, vector<8x384xf32> -> vector<8x384xf32>
    %35 = vector.extract_strided_slice %34 {offsets = [0, 0], sizes = [8, 128], strides = [1, 1]} : vector<8x384xf32> to vector<8x128xf32>
    %36 = vector.broadcast %14 : vector<1x128xf32> to vector<8x128xf32>
    %37 = arith.addf %35, %36 : vector<8x128xf32>
    %cst_34 = arith.constant 0.176776692 : f32
    %38 = vector.broadcast %cst_34 : f32 to vector<8x128xf32>
    %39 = arith.mulf %37, %38 : vector<8x128xf32>
    %40 = vector.extract_strided_slice %34 {offsets = [0, 128], sizes = [8, 128], strides = [1, 1]} : vector<8x384xf32> to vector<8x128xf32>
    %41 = vector.broadcast %16 : vector<1x128xf32> to vector<8x128xf32>
    %42 = arith.addf %40, %41 : vector<8x128xf32>
    %43 = vector.extract_strided_slice %34 {offsets = [0, 256], sizes = [8, 128], strides = [1, 1]} : vector<8x384xf32> to vector<8x128xf32>
    %44 = vector.broadcast %18 : vector<1x128xf32> to vector<8x128xf32>
    %45 = arith.addf %43, %44 : vector<8x128xf32>
    %46 = vector.shape_cast %39 : vector<8x128xf32> to vector<8x4x32xf32>
    %47 = tpu.transpose %46, [1, 0, 2] : vector<8x4x32xf32> -> vector<4x8x32xf32>
    %48 = arith.truncf %47 : vector<4x8x32xf32> to vector<4x8x32xbf16>
    %49 = vector.shape_cast %42 : vector<8x128xf32> to vector<8x4x32xf32>
    %50 = tpu.transpose %49, [1, 0, 2] : vector<8x4x32xf32> -> vector<4x8x32xf32>
    %51 = arith.truncf %50 : vector<4x8x32xf32> to vector<4x8x32xbf16>
    %52 = vector.shape_cast %45 : vector<8x128xf32> to vector<8x4x32xf32>
    %53 = tpu.transpose %52, [1, 0, 2] : vector<8x4x32xf32> -> vector<4x8x32xf32>
    %54 = arith.truncf %53 : vector<4x8x32xf32> to vector<4x8x32xbf16>
    "tpu.trace_start"() <{level = 10 : i32, message = "hqd,hkd->hqk"}> : () -> ()
    %cst_35 = arith.constant dense<0.000000e+00> : vector<4x8x8xf32>
    %55 = tpu.matmul %48, %51, %cst_35 {dimension_numbers = #tpu.dot_dimension_numbers<[2], [2], [1], [1], [0, 0, 0, 1, 1, 1], [0], [0]>} : vector<4x8x32xbf16>, vector<4x8x32xbf16>, vector<4x8x8xf32> -> vector<4x8x8xf32>
    "tpu.trace_stop"() : () -> ()
    %c0_36 = arith.constant 0 : index
    %c0_37 = arith.constant 0 : index
    %56 = vector.load %arg8[%c0_36, %c0_37] : memref<8x8xf32, #tpu.memory_space<vmem>>, vector<8x8xf32>
    %57 = vector.shape_cast %56 : vector<8x8xf32> to vector<1x8x8xf32>
    %58 = vector.broadcast %57 : vector<1x8x8xf32> to vector<4x8x8xf32>
    %59 = arith.addf %55, %58 : vector<4x8x8xf32>
    %cst_38 = arith.constant dense<0xFF800000> : vector<4x8xf32>
    %60 = vector.multi_reduction <maximumf>, %59, %cst_38 [2] : vector<4x8x8xf32> to vector<4x8xf32>
    %61 = vector.shape_cast %60 : vector<4x8xf32> to vector<4x8x1xf32>
    %62 = vector.broadcast %61 : vector<4x8x1xf32> to vector<4x8x8xf32>
    %63 = arith.subf %59, %62 : vector<4x8x8xf32>
    %64 = math.exp %63 : vector<4x8x8xf32>
    %cst_39 = arith.constant dense<0.000000e+00> : vector<4x8xf32>
    %65 = vector.multi_reduction <add>, %64, %cst_39 [2] : vector<4x8x8xf32> to vector<4x8xf32>
    %66 = vector.shape_cast %65 : vector<4x8xf32> to vector<4x8x1xf32>
    %67 = tpu.reciprocal %66 {approx = true} : vector<4x8x1xf32> -> vector<4x8x1xf32>
    %68 = vector.broadcast %67 : vector<4x8x1xf32> to vector<4x8x8xf32>
    %69 = arith.mulf %64, %68 : vector<4x8x8xf32>
    %70 = arith.truncf %69 : vector<4x8x8xf32> to vector<4x8x8xbf16>
    "tpu.trace_start"() <{level = 10 : i32, message = "hqk,hkd->hqd"}> : () -> ()
    %cst_40 = arith.constant dense<0.000000e+00> : vector<4x8x32xf32>
    %71 = tpu.matmul %70, %54, %cst_40 {dimension_numbers = #tpu.dot_dimension_numbers<[2], [1], [1], [2], [0, 0, 0, 1, 1, 2], [0], [0]>} : vector<4x8x8xbf16>, vector<4x8x32xbf16>, vector<4x8x32xf32> -> vector<4x8x32xf32>
    "tpu.trace_stop"() : () -> ()
    %72 = tpu.transpose %71, [1, 0, 2] : vector<4x8x32xf32> -> vector<8x4x32xf32>
    %73 = vector.shape_cast %72 : vector<8x4x32xf32> to vector<8x128xf32>
    %74 = arith.truncf %73 : vector<8x128xf32> to vector<8x128xbf16>
    %cst_41 = arith.constant dense<0.000000e+00> : vector<8x128xf32>
    %75 = tpu.matmul %74, %8, %cst_41 {dimension_numbers = #tpu.dot_dimension_numbers<[1], [0], [0], [1], [0, 0, 1, 1], [], []>} : vector<8x128xbf16>, vector<128x128xbf16>, vector<8x128xf32> -> vector<8x128xf32>
    %76 = vector.broadcast %20 : vector<1x128xf32> to vector<8x128xf32>
    %77 = arith.addf %75, %76 : vector<8x128xf32>
    %78 = arith.addf %4, %77 : vector<8x128xf32>
    %cst_42 = arith.constant dense<0.000000e+00> : vector<8xf32>
    %79 = vector.multi_reduction <add>, %78, %cst_42 [1] : vector<8x128xf32> to vector<8xf32>
    %80 = vector.shape_cast %79 : vector<8xf32> to vector<8x1xf32>
    %cst_43 = arith.constant 1.280000e+02 : f32
    %81 = vector.broadcast %cst_43 : f32 to vector<8x1xf32>
    %82 = arith.divf %80, %81 : vector<8x1xf32>
    %83 = vector.broadcast %82 : vector<8x1xf32> to vector<8x128xf32>
    %84 = arith.subf %78, %83 : vector<8x128xf32>
    %85 = arith.mulf %84, %84 : vector<8x128xf32>
    %cst_44 = arith.constant dense<0.000000e+00> : vector<8xf32>
    %86 = vector.multi_reduction <add>, %85, %cst_44 [1] : vector<8x128xf32> to vector<8xf32>
    %87 = vector.shape_cast %86 : vector<8xf32> to vector<8x1xf32>
    %cst_45 = arith.constant 0.00787401571 : f32
    %88 = vector.broadcast %cst_45 : f32 to vector<8x1xf32>
    %89 = arith.mulf %87, %88 : vector<8x1xf32>
    %90 = math.sqrt %89 : vector<8x1xf32>
    %cst_46 = arith.constant 9.99999997E-7 : f32
    %91 = vector.broadcast %cst_46 : f32 to vector<8x1xf32>
    %92 = arith.addf %90, %91 : vector<8x1xf32>
    %cst_47 = arith.constant 1.000000e+00 : f32
    %93 = vector.broadcast %cst_47 : f32 to vector<8x1xf32>
    %94 = arith.divf %93, %92 : vector<8x1xf32>
    %95 = vector.broadcast %94 : vector<8x1xf32> to vector<8x128xf32>
    %96 = arith.mulf %84, %95 : vector<8x128xf32>
    %97 = vector.broadcast %26 : vector<1x128xf32> to vector<8x128xf32>
    %98 = arith.mulf %96, %97 : vector<8x128xf32>
    %99 = vector.broadcast %28 : vector<1x128xf32> to vector<8x128xf32>
    %100 = arith.addf %98, %99 : vector<8x128xf32>
    %101 = arith.truncf %100 : vector<8x128xf32> to vector<8x128xbf16>
    %cst_48 = arith.constant dense<0.000000e+00> : vector<8x256xf32>
    %102 = tpu.matmul %101, %10, %cst_48 {dimension_numbers = #tpu.dot_dimension_numbers<[1], [0], [0], [1], [0, 0, 1, 1], [], []>} : vector<8x128xbf16>, vector<128x256xbf16>, vector<8x256xf32> -> vector<8x256xf32>
    %103 = vector.broadcast %22 : vector<1x256xf32> to vector<8x256xf32>
    %104 = arith.addf %102, %103 : vector<8x256xf32>
    %cst_49 = arith.constant 0.000000e+00 : f32
    %105 = vector.broadcast %cst_49 : f32 to vector<8x256xf32>
    %106 = arith.maximumf %104, %105 : vector<8x256xf32>
    %107 = arith.truncf %106 : vector<8x256xf32> to vector<8x256xbf16>
    %cst_50 = arith.constant dense<0.000000e+00> : vector<8x128xf32>
    %108 = tpu.matmul %107, %12, %cst_50 {dimension_numbers = #tpu.dot_dimension_numbers<[1], [0], [0], [1], [0, 0, 1, 1], [], []>} : vector<8x256xbf16>, vector<256x128xbf16>, vector<8x128xf32> -> vector<8x128xf32>
    %109 = vector.broadcast %24 : vector<1x128xf32> to vector<8x128xf32>
    %110 = arith.addf %108, %109 : vector<8x128xf32>
    %111 = arith.addf %100, %110 : vector<8x128xf32>
    %cst_51 = arith.constant dense<0.000000e+00> : vector<8xf32>
    %112 = vector.multi_reduction <add>, %111, %cst_51 [1] : vector<8x128xf32> to vector<8xf32>
    %113 = vector.shape_cast %112 : vector<8xf32> to vector<8x1xf32>
    %cst_52 = arith.constant 1.280000e+02 : f32
    %114 = vector.broadcast %cst_52 : f32 to vector<8x1xf32>
    %115 = arith.divf %113, %114 : vector<8x1xf32>
    %116 = vector.broadcast %115 : vector<8x1xf32> to vector<8x128xf32>
    %117 = arith.subf %111, %116 : vector<8x128xf32>
    %118 = arith.mulf %117, %117 : vector<8x128xf32>
    %cst_53 = arith.constant dense<0.000000e+00> : vector<8xf32>
    %119 = vector.multi_reduction <add>, %118, %cst_53 [1] : vector<8x128xf32> to vector<8xf32>
    %120 = vector.shape_cast %119 : vector<8xf32> to vector<8x1xf32>
    %cst_54 = arith.constant 0.00787401571 : f32
    %121 = vector.broadcast %cst_54 : f32 to vector<8x1xf32>
    %122 = arith.mulf %120, %121 : vector<8x1xf32>
    %123 = math.sqrt %122 : vector<8x1xf32>
    %cst_55 = arith.constant 9.99999997E-7 : f32
    %124 = vector.broadcast %cst_55 : f32 to vector<8x1xf32>
    %125 = arith.addf %123, %124 : vector<8x1xf32>
    %cst_56 = arith.constant 1.000000e+00 : f32
    %126 = vector.broadcast %cst_56 : f32 to vector<8x1xf32>
    %127 = arith.divf %126, %125 : vector<8x1xf32>
    %128 = vector.broadcast %127 : vector<8x1xf32> to vector<8x128xf32>
    %129 = arith.mulf %117, %128 : vector<8x128xf32>
    %130 = vector.broadcast %30 : vector<1x128xf32> to vector<8x128xf32>
    %131 = arith.mulf %129, %130 : vector<8x128xf32>
    %132 = vector.broadcast %32 : vector<1x128xf32> to vector<8x128xf32>
    %133 = arith.addf %131, %132 : vector<8x128xf32>
    %134 = vector.shape_cast %133 : vector<8x128xf32> to vector<1x8x128xf32>
    %c0_57 = arith.constant 0 : index
    %c0_58 = arith.constant 0 : index
    %c0_59 = arith.constant 0 : index
    %135 = vector.load %arg7[%c0_57, %c0_58, %c0_59] : memref<1x8x128xf32, #tpu.memory_space<vmem>>, vector<1x8x128xf32>
    tpu.vector_store %arg7[%c0_57, %c0_58, %c0_59], %134 {strides = array<i32>} : memref<1x8x128xf32, #tpu.memory_space<vmem>>, vector<1x8x128xf32>,
    %c1_i32 = arith.constant 1 : i32
    %136 = arith.cmpi eq, %arg1, %c1_i32 : i32
    %137 = arith.extui %136 : i1 to i32
    %c0_i32_60 = arith.constant 0 : i32
    %138 = arith.cmpi ne, %137, %c0_i32_60 : i32
    scf.if %138 {
      %139 = vector.shape_cast %133 : vector<8x128xf32> to vector<1x8x128xf32>
      %c0_61 = arith.constant 0 : index
      %c0_62 = arith.constant 0 : index
      %c0_63 = arith.constant 0 : index
      %140 = vector.load %arg6[%c0_61, %c0_62, %c0_63] : memref<1x8x128xf32, #tpu.memory_space<vmem>>, vector<1x8x128xf32>
      tpu.vector_store %arg6[%c0_61, %c0_62, %c0_63], %139 {strides = array<i32>} : memref<1x8x128xf32, #tpu.memory_space<vmem>>, vector<1x8x128xf32>,
    } else {
    }
    return
  }
  func.func @transform_0(%arg0: i32, %arg1: i32) -> (i32, i32, i32) {
    %c0_i32 = arith.constant 0 : i32
    %c0_i32_0 = arith.constant 0 : i32
    %c0_i32_1 = arith.constant 0 : i32
    return %arg0, %c0_i32, %c0_i32_0 : i32, i32, i32
  }
  func.func @transform_1(%arg0: i32, %arg1: i32) -> (i32, i32, i32) {
    %c0_i32 = arith.constant 0 : i32
    %c0_i32_0 = arith.constant 0 : i32
    %c0_i32_1 = arith.constant 0 : i32
    return %arg1, %c0_i32, %c0_i32_0 : i32, i32, i32
  }
  func.func @transform_2(%arg0: i32, %arg1: i32) -> (i32, i32, i32) {
    %c0_i32 = arith.constant 0 : i32
    %c0_i32_0 = arith.constant 0 : i32
    %c0_i32_1 = arith.constant 0 : i32
    return %arg1, %c0_i32, %c0_i32_0 : i32, i32, i32
  }
  func.func @transform_3(%arg0: i32, %arg1: i32) -> (i32, i32, i32) {
    %c0_i32 = arith.constant 0 : i32
    %c0_i32_0 = arith.constant 0 : i32
    %c0_i32_1 = arith.constant 0 : i32
    return %arg1, %c0_i32, %c0_i32_0 : i32, i32, i32
  }
  func.func @transform_4(%arg0: i32, %arg1: i32) -> (i32, i32, i32) {
    %c0_i32 = arith.constant 0 : i32
    %c0_i32_0 = arith.constant 0 : i32
    %c0_i32_1 = arith.constant 0 : i32
    return %arg0, %c0_i32, %c0_i32_0 : i32, i32, i32
  }
}

module attributes {stable_mosaic.version = 11 : i64} {
  func.func @unembed_kernel(%arg0: i32, %arg1: memref<16x128xbf16, #tpu.memory_space<vmem>>, %arg2: memref<128x128xbf16, #tpu.memory_space<vmem>>, %arg3: memref<1x128xf32, #tpu.memory_space<vmem>>, %arg4: memref<16x128xf32, #tpu.memory_space<vmem>>) attributes {dimension_semantics = [#tpu.dimension_semantics<parallel>], iteration_bounds = array<i64: 1>, scalar_prefetch = 0 : i64, scratch_operands = 0 : i64, tpu.core_type = #tpu.core_type<tc>, window_params = [{pipeline_mode = #tpu.pipeline_mode<synchronous>, transform_indices = @transform_0, window_bounds = array<i64: 16, 128>}, {transform_indices = @transform_1, window_bounds = array<i64: 128, 128>}, {transform_indices = @transform_2, window_bounds = array<i64: 1, 128>}, {transform_indices = @transform_3, window_bounds = array<i64: 16, 128>}]} {
    %c0 = arith.constant 0 : index
    %c0_0 = arith.constant 0 : index
    %0 = vector.load %arg1[%c0, %c0_0] : memref<16x128xbf16, #tpu.memory_space<vmem>>, vector<16x128xbf16>
    %c0_1 = arith.constant 0 : index
    %c0_2 = arith.constant 0 : index
    %1 = vector.load %arg2[%c0_1, %c0_2] : memref<128x128xbf16, #tpu.memory_space<vmem>>, vector<128x128xbf16>
    %cst = arith.constant dense<0.000000e+00> : vector<16x128xf32>
    %2 = tpu.matmul %0, %1, %cst {dimension_numbers = #tpu.dot_dimension_numbers<[1], [0], [0], [1], [0, 0, 1, 1], [], []>} : vector<16x128xbf16>, vector<128x128xbf16>, vector<16x128xf32> -> vector<16x128xf32>
    %c0_3 = arith.constant 0 : index
    %c0_4 = arith.constant 0 : index
    %3 = vector.load %arg3[%c0_3, %c0_4] : memref<1x128xf32, #tpu.memory_space<vmem>>, vector<1x128xf32>
    %4 = vector.broadcast %3 : vector<1x128xf32> to vector<16x128xf32>
    %5 = arith.addf %2, %4 : vector<16x128xf32>
    %c0_5 = arith.constant 0 : index
    %c0_6 = arith.constant 0 : index
    %6 = vector.load %arg4[%c0_5, %c0_6] : memref<16x128xf32, #tpu.memory_space<vmem>>, vector<16x128xf32>
    tpu.vector_store %arg4[%c0_5, %c0_6], %5 {strides = array<i32>} : memref<16x128xf32, #tpu.memory_space<vmem>>, vector<16x128xf32>,
    return
  }
  func.func @transform_0(%arg0: i32) -> (i32, i32) {
    %c0_i32 = arith.constant 0 : i32
    %c0_i32_0 = arith.constant 0 : i32
    %c0_i32_1 = arith.constant 0 : i32
    return %c0_i32, %c0_i32_0 : i32, i32
  }
  func.func @transform_1(%arg0: i32) -> (i32, i32) {
    %c0_i32 = arith.constant 0 : i32
    %c0_i32_0 = arith.constant 0 : i32
    return %c0_i32, %arg0 : i32, i32
  }
  func.func @transform_2(%arg0: i32) -> (i32, i32) {
    %c0_i32 = arith.constant 0 : i32
    %c0_i32_0 = arith.constant 0 : i32
    return %c0_i32, %arg0 : i32, i32
  }
  func.func @transform_3(%arg0: i32) -> (i32, i32) {
    %c0_i32 = arith.constant 0 : i32
    %c0_i32_0 = arith.constant 0 : i32
    return %c0_i32, %arg0 : i32, i32
  }
}

</mosaic_0001>

<bundles_post_ra>
// kernel: transformer_forward.3
= control target key start
LH: loop header
LB: loop body
LE: loop exit
PB: predicated region body
PF: predicated region fallthrough
CT: control target
= control target key end

     0   :  { %s256_s0 = inlined_call_operand.vmem [shape: bf16[16,128], index: 0, kind: input, shape index: {}]   ;;  %s257_s1 = inlined_call_operand.vmem [shape: bf16[128,128], index: 1, kind: input, shape index: {}]   ;;  %s258_s2 = inlined_call_operand.vmem [shape: f32[1,128], index: 2, kind: input, shape index: {}]   ;;  %s259_s3 = inlined_call_operand.hbm [shape: f32[16,128], index: 3, kind: output, shape index: {}]  }
   0x1   :  { %v169_v0 = vld [vmem:[%s257_s1 + $0x38] sm:$0xff]  ;;  %v168_v1 = vld [vmem:[%s257_s1 + $0x30] sm:$0xff] }
   0x2   :  { %91 = vmatpush.bf16.msra.mxu0 %v169_v0 }
   0x3   :  { %8 = vsyncpa [#allocation3], 0  ;;  %v167_v2 = vld [vmem:[%s257_s1 + $0x28] sm:$0xff]  ;;  %v166_v3 = vld [vmem:[%s257_s1 + $0x20] sm:$0xff]  ;;  %s200_s5 = smov [#allocation2]   ;;  %s113_s9 = sshll.u32 %s259_s3, 4  ;;  %s114_s9 = int_to_ptr.hbm [resolvable:$true] %s113_s9 }
   0x4   :  { %v165_v4 = vld [vmem:[%s257_s1 + $0x18] sm:$0xff]  ;;  %v164_v5 = vld [vmem:[%s257_s1 + $0x10] sm:$0xff]  ;;  %v163_v6 = vld [vmem:[%s257_s1 + $0x8] sm:$0xff]  ;;  %s111_s6 = sshll.u32 %s200_s5, 4  ;;  %s112_s6 = int_to_ptr.vmem [resolvable:$true] %s111_s6 }
   0x5   :  { %v162_v7 = vld [vmem:[%s257_s1] sm:$0xff]  ;;  %s202_s1 = smov 8  }
   0x6   :  { %92 = vmatpush.bf16.msra.mxu0 %v168_v1  ;;  %v161_v8 = vld [vmem:[%s256_s0] sm:$0xff]  ;;  %s201_s0 = smov 128  }
   0x7   :  { %v173_v9 = vld [vmem:[%s258_s2] ss:$0 sm:$0xff] }
   0xa   :  { %93 = vmatpush.bf16.msra.mxu0 %v167_v2 }
   0xe   :  { %94 = vmatpush.bf16.msra.mxu0 %v166_v3 }
  0x12   :  { %95 = vmatpush.bf16.msra.mxu0 %v165_v4 }
  0x16   :  { %96 = vmatpush.bf16.msra.mxu0 %v164_v5 }
  0x1a   :  { %97 = vmatpush.bf16.msra.mxu0 %v163_v6 }
  0x1e   :  { %98 = vmatpush.bf16.msra.mxu0 %v162_v7 }
  0x21   :  { %99 = vmatmul.bf16.vlgmr.msra.gmra.mxu0 %v161_v8 }
  0x9e   :  { %v100_v10 = vpop.f32.mrf.mxu0 }
  0x9f   :  { %v101_v11 = vadd.f32 %v173_v9, %v100_v10 }
  0xa1   :  { %105 = vst [vmem:[#allocation2] sm:$0xff] %v101_v11 }
  0xa6   :  { %v102_v12 = vpop.f32.mrf.mxu0 }
  0xa7   :  { %v103_v13 = vadd.f32 %v173_v9, %v102_v12 }
  0xa9   :  { %106 = vst [vmem:[#allocation2 + $0x8] sm:$0xff] %v103_v13 }
  0xaa   :  { %119 = dma.vmem_to_hbm [thread:$0]  %s112_s6, 256, %s114_s9, [#allocation3], %s201_s0, %s201_s0, %s202_s1  }
  0xab   :  { %198 = dma.done.wait [#allocation3], 256  }
  0xac   :  { %199 = vsyncadd [#allocation3], 4294967040 }
  0xad   :  { %124 = vsyncpa [#allocation3], 1 }

// kernel: transformer_forward.2
= control target key start
LH: loop header
LB: loop body
LE: loop exit
PB: predicated region body
PF: predicated region fallthrough
CT: control target
= control target key end

     0   :  { %s2971_s0 = inlined_call_operand.vmem [shape: f32[2,8,128], index: 0, kind: input, shape index: {}]   ;;  %s2972_s1 = inlined_call_operand.hbm [shape: bf16[2,128,768], index: 1, kind: input, shape index: {}]   ;;  %s2973_s2 = inlined_call_operand.hbm [shape: bf16[2,256,128], index: 2, kind: input, shape index: {}]   ;;  %s2974_s3 = inlined_call_operand.vmem [shape: f32[2,10,256], index: 3, kind: input, shape index: {}]   ;;  %s2975_s4 = inlined_call_operand.vmem [shape: f32[2,8,128], index: 4, kind: output, shape index: {}]  }
   0x1   :  { %2977 = sst [smem:[#allocation12_spill]] %s2972_s1 }
   0x2   :  { %9 = vsyncpa [#allocation5], 0 }
   0x3   :  { %11 = vsyncpa [#allocation5 + $0x1], 0 }
   0x4   :  { %12 = vsyncpa [#allocation7], 0 }
   0x5   :  { %14 = vsyncpa [#allocation7 + $0x1], 0  ;;  %s2457_s15 = smov 0   ;;  %s2459_s16 = smov 0  }
   0x6   :  { %s2461_s17 = smov 0   ;;  %s2463_s18 = smov 0  }
   0x7   :  { %s2465_s19 = smov 0   ;;  %s2467_s20 = smov 0  }
   0x8   :  { %s2469_s21 = smov 0   ;;  %s2471_s22 = smov 0  }
   0x9 LB: > { %s1824_s23 = sadd.s32 4294967295, %s2419_s22   ;;  %s29_s24 = sadd.s32 1, %s2411_s20  ;;  %s2419_s22 = sphi %s2471_s22, %s20_s22   ;;  %s2415_s21 = sphi %s2469_s21, %s2991_s21   ;;  %s2411_s20 = sphi %s2467_s20, %s2990_s20   ;;  %s2407_s19 = sphi %s2465_s19, %s2989_s19   ;;  %s2403_s18 = sphi %s2463_s18, %s2988_s18   ;;  %s2399_s17 = sphi %s2461_s17, %s2987_s17   ;;  %s2395_s16 = sphi %s2459_s16, %s2986_s16   ;;  %s2391_s15 = sphi %s2457_s15, %s2985_s15  }
   0xa   : > { %p30_p0 = scmp.ge.s32.totalorder %s29_s24, 2  ;;  %s32_s25 = sadd.s32 1, %s2415_s21 }
   0xb   : > { %s65_s26 = sadd.s32 1, %s2399_s17  ;;  %p72_p1 = scmp.ne.s32.totalorder %s2399_s17, %s2395_s16 }
   0xc   : > { %s2993_s24 = smov (%p30_p0, %s29_s24), 0  ;;  %s2995_s25 = smov (!%p30_p0, %s32_s25), %s2415_s21 }
   0xd   : > { %2978 = sst [smem:[#allocation10_spill]] %s2993_s24  ;;  %s62_s27 = ssub.s32 %s2411_s20, %s2993_s24 }
   0xe   : > { %p73_p2 = scmp.eq.s32.totalorder %s2419_s22, 0  ;;  %p34_p3 = scmp.ge.s32.totalorder %s2995_s25, 2 }
   0xf   : > { %p63_p4 = scmp.eq.s32.totalorder %s62_s27, 0  ;;  %p78_p6 = scmp.ne.s32.totalorder %s2395_s16, %s2391_s15 }
  0x10   : > { %p74_p5 = por %p73_p2, %p72_p1  ;;  %s2997_s25 = smov (%p34_p3, %s2995_s25), 0 }
  0x11   : > { %2979 = sst [smem:[#allocation11_spill]] %s2997_s25  ;;  %p79_p7 = scmp.eq.s32.totalorder %s1824_s23, 0 }
  0x12   : > { %s2511_s28 = scalar_select %p63_p4, %s2399_s17, %s65_s26  }
  0x13   : > { %p2187_p8 = scmp.lt.s32.totalorder %s2419_s22, 4  ;;  %s2515_s29 = sand.u32 1, %s2399_s17  }
  0x14   : > { %p2517_p9 = por %p79_p7, %p78_p6  ;;  %s2173_s5 = smul.u32 384, %s2515_s29 }
  0x15   : > { %p2522_p10 = pnand %p2187_p8, %p74_p5  ;;  %s2174_s7 = smul.u32 384, %s2411_s20 }
  0x16   : > { %s2982_s1 = sld [smem:[#allocation12_spill]]  ;;  %s191_s11 = scalar_lea.vmem [#allocation4], %s2173_s5 }
  0x17   : > { %s199_s12 = sshll.u32 %s191_s11, 4  ;;  %s188_s14 = scalar_lea.sflag [#allocation5], %s2515_s29  ;;  %s200_s12 = int_to_ptr.vmem [resolvable:$true] %s199_s12 }
  0x18   : > { %s2421_s15 = smov 384   ;;  %s2422_s23 = smov 24  }
  0x19   : > { %p1832_p11 = scmp.ge.s32.totalorder %s2419_s22, 1  ;;  %p237_p12 = scmp.lt.s32.totalorder %s2419_s22, 5 }
  0x1a   : > { %s1829_s26 = sshll.u32 %s2515_s29, 7  ;;  %s2107_s27 = sshll.u32 %s2411_s20, 7 }
  0x1b   : > { %p238_p13 = pnand %p1832_p11, %p237_p12  ;;  %s213_s25 = scalar_lea.vmem [#allocation6], %s1829_s26 }
  0x1c   : > { %s196_s10 = scalar_lea.hbm %s2982_s1, %s2174_s7  ;;  %s221_s8 = sshll.u32 %s213_s25, 4  ;;  %s222_s8 = int_to_ptr.vmem [resolvable:$true] %s221_s8 }
  0x1d   : > { %s197_s13 = sshll.u32 %s196_s10, 4  ;;  %s218_s9 = scalar_lea.hbm %s2973_s2, %s2107_s27  ;;  %s198_s13 = int_to_ptr.hbm [resolvable:$true] %s197_s13 }
  0x1e   : > { %2183 = dma.hbm_to_vmem [thread:$0]  (!%p2522_p10), %s198_s13, 6144, %s200_s12, %s188_s14, %s2421_s15, %s2421_s15, %s2422_s23  }
  0x1f   : > { %s219_s10 = sshll.u32 %s218_s9, 4  ;;  %s210_s11 = scalar_lea.sflag [#allocation7], %s2515_s29  ;;  %s220_s10 = int_to_ptr.hbm [resolvable:$true] %s219_s10 }
  0x20   : > { %s2423_s1 = smov 64   ;;  %s2424_s24 = smov 4  }
  0x21   : > { %2186 = dma.hbm_to_vmem [thread:$0]  (!%p2522_p10), %s220_s10, 2048, %s222_s8, %s210_s11, %s2423_s1, %s2423_s1, %s2424_s24  }
  0x22   : > { %241 = sbr.rel (%p238_p13) target bundleno = 2056 (0x808), region = 36  ;;  %s243_s12 = sand.u32 (!%p238_p13), 1, %s2395_s16  }
  0x23   : > { %s2175_s13 = smul.u32 (!%p238_p13), 384, %s243_s12  ;;  %s244_s14 = scalar_lea.sflag (!%p238_p13), [#allocation5], %s243_s12 }
  0x25   : > { %s2544_s15 = scalar_lea.vmem (!%p238_p13), [#allocation4], %s2175_s13 }
  0x27   : > { %2382 = dma.done.wait (%p2517_p9), %s244_s14, 6144  }
  0x28   : > { %2384 = vsyncadd (%p2517_p9), %s244_s14, 4294961152  ;;  %s1833_s25 = sshll.u32 %s243_s12, 7  ;;  %s254_s29 = scalar_lea.sflag [#allocation7], %s243_s12 }
  0x29   : > { %s2550_s23 = scalar_lea.vmem [#allocation6], %s1833_s25 }
  0x2a   : > { %2386 = dma.done.wait (%p2517_p9), %s254_s29, 2048  }
  0x2b   : > { %2388 = vsyncadd (%p2517_p9), %s254_s29, 4294965248  ;;  %p296_p0 = scmp.lt.s32.totalorder %s2407_s19, 1  ;;  %p300_p1 = scmp.lt.s32.totalorder %s2403_s18, 1 }
  0x2c   : > { %p1838_p2 = scmp.ne.s32.totalorder %s2403_s18, 0 }
  0x2d   : > { %s2999_s19 = smov (!%p296_p0, %s2407_s19), 1 }
  0x2e   : > { %s301_s1 = scalar_select %p300_p1, %s2403_s18, 1 }
  0x2f   : > { %s1834_s24 = sshll.u32 %s2999_s19, 3  ;;  %313 = sbr.rel (%p1838_p2) target bundleno = 59 (0x3b), region = 48 }
  0x30   : > { %s299_s27 = scalar_lea.vmem %s2971_s0, %s1834_s24  ;;  %s2108_s8 = sshll.u32 %s301_s1, 5 }
  0x31   : > { %s2566_s9 = scalar_lea.vmem %s2974_s3, %s2108_s8  ;;  %s2571_s11 = scalar_lea.vmem %s2975_s4, %s1834_s24 }
  0x34   : > { %v314_v0 = vld [vmem:[%s299_s27] sm:$0xff]  ;;  %v316_v1 = vlaneseq  ;;  %vm322_vm0 = vcmask 64512   ;;  %v2425_v4 = vmov -1e+30  }
  0x35   : > { %315 = vst [vmem:[#allocation2] sm:$0xff] %v314_v0 }
  0x36   : > { %v317_v2 = vshrl.u32 %v316_v1, 7  ;;  %v319_v3 = vand.u32 127, %v316_v1 }
  0x38   : > { %vm320_vm1 = vcmp.ge.s32.totalorder %v317_v2, %v319_v3 }
  0x39   : > { %v321_v5 = vsel %vm320_vm1, 0.0, %v2425_v4 }
  0x3a   : > { %323 = vst.msk [vmem:[#allocation3] sm:$0xff] %vm322_vm0, %v321_v5 }
  0x3b PF: > { %v1926_v6 = vld [vmem:[%s2544_s15 + $0x150] sm:$0xf]  ;;  %v2131_v7 = vld [vmem:[%s2544_s15 + $0x164] sm:$0xf0]  ;;  %v2130_v8 = vld [vmem:[%s2544_s15 + $0x154] sm:$0xf] }
  0x3c   : > { %v1927_v9 = vor.u32 %v2131_v7, %v1926_v6  ;;  %v1928_v10 = vld [vmem:[%s2544_s15 + $0x168] sm:$0xf0]  ;;  %v1914_v11 = vld [vmem:[%s2544_s15 + $0x120] sm:$0xf]  ;;  %v2128_v12 = vld [vmem:[%s2544_s15 + $0x134] sm:$0xf0] }
  0x3d   : > { %v1931_v13 = vor.u32 %v2130_v8, %v1928_v10  ;;  %v2127_v14 = vld [vmem:[%s2544_s15 + $0x124] sm:$0xf]  ;;  %v1916_v15 = vld [vmem:[%s2544_s15 + $0x138] sm:$0xf0]  ;;  %v1915_v16 = vor.u32 %v2128_v12, %v1914_v11  ;;  %v1902_v18 = vld [vmem:[%s2544_s15 + $0xf0] sm:$0xf] }
  0x3e   : > { %561 = vmatpush.bf16.msra.mxu0 %v1927_v9  ;;  %v1919_v17 = vor.u32 %v2127_v14, %v1916_v15  ;;  %v2125_v19 = vld [vmem:[%s2544_s15 + $0x104] sm:$0xf0]  ;;  %v2124_v20 = vld [vmem:[%s2544_s15 + $0xf4] sm:$0xf]  ;;  %v1904_v21 = vld [vmem:[%s2544_s15 + $0x108] sm:$0xf0] }
  0x3f   : > { %574 = vmatpush.bf16.msra.mxu1 %v1931_v13  ;;  %v1903_v22 = vor.u32 %v2125_v19, %v1902_v18  ;;  %v1907_v23 = vor.u32 %v2124_v20, %v1904_v21  ;;  %v1890_v24 = vld [vmem:[%s2544_s15 + $0xc0] sm:$0xf]  ;;  %v2122_v25 = vld [vmem:[%s2544_s15 + $0xd4] sm:$0xf0]  ;;  %v2121_v26 = vld [vmem:[%s2544_s15 + $0xc4] sm:$0xf] }
  0x40   : > { %v1892_v27 = vld [vmem:[%s2544_s15 + $0xd8] sm:$0xf0]  ;;  %v1891_v28 = vor.u32 %v2122_v25, %v1890_v24  ;;  %v1878_v30 = vld [vmem:[%s2544_s15 + $0x90] sm:$0xf]  ;;  %v2119_v31 = vld [vmem:[%s2544_s15 + $0xa4] sm:$0xf0] }
  0x41   : > { %v1895_v29 = vor.u32 %v2121_v26, %v1892_v27  ;;  %v2118_v32 = vld [vmem:[%s2544_s15 + $0x94] sm:$0xf]  ;;  %v1880_v33 = vld [vmem:[%s2544_s15 + $0xa8] sm:$0xf0]  ;;  %v1879_v34 = vor.u32 %v2119_v31, %v1878_v30  ;;  %v1866_v36 = vld [vmem:[%s2544_s15 + $0x60] sm:$0xf] }
  0x42   : > { %562 = vmatpush.bf16.msra.mxu0 %v1915_v16  ;;  %v1883_v35 = vor.u32 %v2118_v32, %v1880_v33  ;;  %v2116_v37 = vld [vmem:[%s2544_s15 + $0x74] sm:$0xf0]  ;;  %v2115_v38 = vld [vmem:[%s2544_s15 + $0x64] sm:$0xf]  ;;  %v1868_v39 = vld [vmem:[%s2544_s15 + $0x78] sm:$0xf0] }
  0x43   : > { %575 = vmatpush.bf16.msra.mxu1 %v1919_v17  ;;  %v1867_v40 = vor.u32 %v2116_v37, %v1866_v36  ;;  %v1871_v41 = vor.u32 %v2115_v38, %v1868_v39  ;;  %v1854_v42 = vld [vmem:[%s2544_s15 + $0x30] sm:$0xf]  ;;  %v2113_v43 = vld [vmem:[%s2544_s15 + $0x44] sm:$0xf0]  ;;  %v2112_v44 = vld [vmem:[%s2544_s15 + $0x34] sm:$0xf] }
  0x44   : > { %v1856_v45 = vld [vmem:[%s2544_s15 + $0x48] sm:$0xf0]  ;;  %v1855_v46 = vor.u32 %v2113_v43, %v1854_v42  ;;  %v1842_v48 = vld [vmem:[%s2544_s15] sm:$0xf]  ;;  %v2110_v49 = vld [vmem:[%s2544_s15 + $0x14] sm:$0xf0] }
  0x45   : > { %v1859_v47 = vor.u32 %v2112_v44, %v1856_v45  ;;  %v2109_v50 = vld [vmem:[%s2544_s15 + $0x4] sm:$0xf]  ;;  %v1844_v51 = vld [vmem:[%s2544_s15 + $0x18] sm:$0xf0]  ;;  %v1843_v52 = vor.u32 %v2110_v49, %v1842_v48  ;;  %v2606_v53 = vld [vmem:[#allocation2] sm:$0xff]  ;;  %s2426_s19 = smov 32  }
  0x46   : > { %563 = vmatpush.bf16.msra.mxu0 %v1903_v22  ;;  %v1847_v54 = vor.u32 %v2109_v50, %v1844_v51  ;;  %v2610_v55 = vpack.c.bf16 %v2606_v53, %v2606_v53  ;;  %v421_v56 = vld [vmem:[%s2566_s9] ss:$0 sm:$0xff]  ;;  %v422_v57 = vld [vmem:[%s2566_s9 + $0x1] ss:$0 sm:$0xff]  ;;  %s2427_s12 = smov 96   ;;  %s2428_s13 = smov 64  }
  0x47   : > { %576 = vmatpush.bf16.msra.mxu1 %v1907_v23  ;;  %v2429_v2 = vmov 1983009808   ;;  %vm615_vm2 = vcmask 1047556   ;;  %v2430_v15 = vmov 1934713408   ;;  %vm978_vm3 = vcmask 261120  }
  0x48   : > { %v620_v3 = vunpack.c.l.s4 %v2429_v2  ;;  %v644_v16 = vunpack.c.l.s4 %v2430_v15  ;;  %vm1055_vm4 = vcmask 64512   ;;  %vm1107_vm5 = vcmask 1043456   ;;  %p2104_p3 = scmp.ne.s32.totalorder %s2403_s18, 1 }
  0x49   : > { %vm1304_vm6 = vcmask 523264   ;;  %vm1306_vm7 = vcmask 785408  }
  0x4a   : > { %564 = vmatpush.bf16.msra.mxu0 %v1891_v28  ;;  %v2623_v11 = vunpack.c.0.s8 %v620_v3  ;;  %v2632_v24 = vunpack.c.0.s8 %v644_v16 }
  0x4b   : > { %577 = vmatpush.bf16.msra.mxu1 %v1895_v29 }
  0x4e   : > { %565 = vmatpush.bf16.msra.mxu0 %v1879_v34 }
  0x4f   : > { %578 = vmatpush.bf16.msra.mxu1 %v1883_v35 }
  0x52   : > { %566 = vmatpush.bf16.msra.mxu0 %v1867_v40 }
  0x53   : > { %579 = vmatpush.bf16.msra.mxu1 %v1871_v41 }
  0x56   : > { %567 = vmatpush.bf16.msra.mxu0 %v1855_v46 }
  0x57   : > { %580 = vmatpush.bf16.msra.mxu1 %v1859_v47 }
  0x5a   : > { %568 = vmatpush.bf16.msra.mxu0 %v1843_v52 }
  0x5b   : > { %581 = vmatpush.bf16.msra.mxu1 %v1847_v54 }
  0x5d   : > { %569 = vmatmul.bf16.vlgmr.msra.gmra.mxu0 %v2610_v55 }
  0x5e   : > { %582 = vmatmul.bf16.vlgmr.msra.gmra.mxu1 %v2610_v55 }
  0xda   : > { %v570_v58 = vpop.f32.mrf.mxu0 }
  0xdb   : > { %v600_v59 = vadd.f32 %v570_v58, %v421_v56  ;;  %v583_v60 = vpop.f32.mrf.mxu1 }
  0xdc   : > { %v602_v61 = vadd.f32 %v583_v60, %v422_v57 }
  0xdd   : > { %v601_v62 = vmul.f32 0.17677669, %v600_v59 }
  0xde   : > { %736 = vrot.lane.b32.xlu1 %v602_v61, %s2426_s19  ;;  %730 = vrot.lane.b32.xlu0 %v602_v61, %s2427_s12  ;;  %v741_v22 = vrot.slane %v602_v61, 4 }
  0xdf   : > { %608 = vrot.lane.b32.xlu2 %v601_v62, %s2428_s13  ;;  %v617_v9 = vrot.slane %v601_v62, 4 }
  0xe2   : > { %v572_v63 = vpop.f32.mrf.mxu0 }
  0xe3   : > { %v585_v0 = vpop.f32.mrf.mxu1 }
  0xe6   : > { %733 = vrot.lane.b32.xlu0 %v602_v61, %s2428_s13  ;;  %605 = vrot.lane.b32.xlu1 %v601_v62, %s2427_s12 }
  0xe7   : > { %611 = vrot.lane.b32.xlu2 %v601_v62, %s2426_s19 }
 0x139   : > { %v609_v1 = vpop.permute.xlu2 %608 }
 0x13a   : > { %v614_v4 = vrot.slane %v609_v1, 4  ;;  %v618_v17 = vsel %vm615_vm2, %v609_v1, %v617_v9 }
 0x13b   : > { %v626_v23 = vperm.slane %v618_v17, %v2623_v11 }
 0x13c   : > { %v616_v12 = vsel %vm615_vm2, %v614_v4, %v601_v62 }
 0x13d   : > { %v622_v19 = vperm.slane %v616_v12, %v2623_v11  ;;  %v653_v42 = vrot.slane %v626_v23, 4 }
 0x13f   : > { %v641_v34 = vrot.slane %v622_v19, 4 }
 0x141   : > { %v612_v13 = vpop.permute.xlu2 %611 }
 0x142   : > { %v627_v20 = vrot.slane %v612_v13, 4 }
 0x150   : > { %v737_v5 = vpop.permute.xlu1 %736  ;;  %v731_v6 = vpop.permute.xlu0 %730 }
 0x151   : > { %v751_v7 = vrot.slane %v737_v5, 4  ;;  %v753_v8 = vrot.slane %v731_v6, 4 }
 0x153   : > { %v754_v10 = vsel %vm615_vm2, %v737_v5, %v753_v8  ;;  %v752_v14 = vsel %vm615_vm2, %v751_v7, %v731_v6 }
 0x154   : > { %v762_v18 = vperm.slane %v754_v10, %v2623_v11  ;;  %v758_v21 = vperm.slane %v752_v14, %v2623_v11 }
 0x156   : > { %v775_v31 = vrot.slane %v762_v18, 4  ;;  %v763_v35 = vrot.slane %v758_v21, 4 }
 0x158   : > { %v734_v25 = vpop.permute.xlu0 %733  ;;  %v606_v26 = vpop.permute.xlu1 %605 }
 0x159   : > { %v739_v27 = vrot.slane %v734_v25, 4  ;;  %v742_v28 = vsel %vm615_vm2, %v734_v25, %v741_v22  ;;  %v628_v29 = vsel %vm615_vm2, %v627_v20, %v606_v26  ;;  %v629_v30 = vrot.slane %v606_v26, 4 }
 0x15a   : > { %v750_v32 = vperm.slane %v742_v28, %v2623_v11  ;;  %v634_v33 = vperm.slane %v628_v29, %v2623_v11 }
 0x15b   : > { %v740_v36 = vsel %vm615_vm2, %v739_v27, %v602_v61  ;;  %v630_v37 = vsel %vm615_vm2, %v612_v13, %v629_v30 }
 0x15c   : > { %v746_v38 = vperm.slane %v740_v36, %v2623_v11  ;;  %v776_v39 = vsel %vm615_vm2, %v775_v31, %v750_v32  ;;  %v777_v40 = vrot.slane %v750_v32, 4  ;;  %v638_v41 = vperm.slane %v630_v37, %v2623_v11 }
 0x15d   : > { %v782_v43 = vperm.slane %v776_v39, %v2632_v24  ;;  %v639_v44 = vrot.slane %v634_v33, 4  ;;  %v642_v45 = vsel %vm615_vm2, %v634_v33, %v641_v34 }
 0x15e   : > { %v764_v46 = vsel %vm615_vm2, %v763_v35, %v746_v38  ;;  %v765_v47 = vrot.slane %v746_v38, 4  ;;  %v778_v48 = vsel %vm615_vm2, %v762_v18, %v777_v40  ;;  %v650_v49 = vperm.slane %v642_v45, %v2632_v24  ;;  %v1934_v45 = vld [vmem:[%s2544_s15 + $0x158] sm:$0xf] }
 0x15f   : > { %v770_v50 = vperm.slane %v764_v46, %v2632_v24  ;;  %v786_v51 = vperm.slane %v778_v48, %v2632_v24  ;;  %v791_v52 = vrot.slane %v782_v43, 4  ;;  %v640_v54 = vsel %vm615_vm2, %v639_v44, %v622_v19  ;;  %v2132_v46 = vld [vmem:[%s2544_s15 + $0x16c] sm:$0xf0] }
 0x160   : > { %v766_v56 = vsel %vm615_vm2, %v758_v21, %v765_v47  ;;  %v646_v57 = vperm.slane %v640_v54, %v2632_v24  ;;  %v651_v58 = vrot.slane %v638_v41, 4  ;;  %v654_v59 = vsel %vm615_vm2, %v638_v41, %v653_v42 }
 0x161   : > { %v774_v60 = vperm.slane %v766_v56, %v2632_v24  ;;  %v787_v61 = vrot.slane %v770_v50, 4  ;;  %v792_v62 = vsel %vm615_vm2, 0.0, %v791_v52  ;;  %v793_v63 = vrot.slane %v786_v51, 4 }
 0x162   : > { %v652_v0 = vsel %vm615_vm2, %v651_v58, %v626_v23  ;;  %v662_v1 = vperm.slane %v654_v59, %v2632_v24  ;;  %v663_v2 = vrot.slane %v646_v57, 4  ;;  %v665_v3 = vrot.slane %v650_v49, 4 }
 0x163   : > { %v788_v4 = vsel %vm615_vm2, 0.0, %v787_v61  ;;  %v789_v5 = vrot.slane %v774_v60, 4  ;;  %v794_v6 = vsel %vm615_vm2, 0.0, %v793_v63  ;;  %v806_v7 = vsel %vm615_vm2, %v793_v63, %v782_v43 }
 0x164   : > { %v810_v8 = vperm.slane %v806_v7, %v2623_v11  ;;  %v811_v9 = vrot.slane %v794_v6, 4  ;;  %v658_v10 = vperm.slane %v652_v0, %v2632_v24  ;;  %v664_v12 = vsel %vm615_vm2, 0.0, %v663_v2  ;;  %v1922_v7 = vld [vmem:[%s2544_s15 + $0x128] sm:$0xf] }
 0x165   : > { %v790_v13 = vsel %vm615_vm2, 0.0, %v789_v5  ;;  %v666_v14 = vsel %vm615_vm2, 0.0, %v665_v3  ;;  %v669_v15 = vrot.slane %v662_v1, 4  ;;  %v671_v16 = vsel %vm615_vm2, %v665_v3, %v646_v57 }
 0x166   : > { %v800_v17 = vrot.slane %v790_v13, 4  ;;  %v812_v18 = vsel %vm615_vm2, %v811_v9, %v792_v62  ;;  %v667_v19 = vrot.slane %v658_v10, 4  ;;  %v676_v20 = vrot.slane %v666_v14, 4  ;;  %v1910_v14 = vld [vmem:[%s2544_s15 + $0xf8] sm:$0xf] }
 0x167   : > { %v816_v21 = vperm.slane %v812_v18, %v2623_v11  ;;  %v670_v22 = vsel %vm615_vm2, 0.0, %v669_v15  ;;  %v795_v23 = vsel %vm615_vm2, %v789_v5, %v770_v50  ;;  %v831_v25 = vrot.slane %v810_v8, 4 }
 0x168   : > { %v668_v26 = vsel %vm615_vm2, 0.0, %v667_v19  ;;  %v677_v27 = vsel %vm615_vm2, %v676_v20, %v664_v12  ;;  %v687_v28 = vrot.slane %v670_v22, 4  ;;  %v799_v29 = vperm.slane %v795_v23, %v2623_v11  ;;  %v2126_v19 = vld [vmem:[%s2544_s15 + $0x10c] sm:$0xf0] }
 0x169   : > { %v801_v30 = vsel %vm615_vm2, %v800_v17, %v788_v4  ;;  %v829_v31 = vrot.slane %v816_v21, 4  ;;  %v832_v32 = vsel %vm615_vm2, %v816_v21, %v831_v25  ;;  %v675_v33 = vperm.slane %v671_v16, %v2623_v11 }
 0x16a   : > { %v805_v34 = vperm.slane %v801_v30, %v2623_v11  ;;  %v819_v35 = vrot.slane %v799_v29, 4  ;;  %v840_v36 = vperm.slane %v832_v32, %v2632_v24  ;;  %v681_v37 = vperm.slane %v677_v27, %v2623_v11  ;;  %v1898_v32 = vld [vmem:[%s2544_s15 + $0xc8] sm:$0xf] }
 0x16b   : > { %v830_v38 = vsel %vm615_vm2, %v829_v31, %v810_v8  ;;  %v682_v39 = vsel %vm615_vm2, %v669_v15, %v658_v10  ;;  %v688_v40 = vsel %vm615_vm2, %v687_v28, %v668_v26  ;;  %v695_v41 = vrot.slane %v675_v33, 4  ;;  %v2129_v8 = vld [vmem:[%s2544_s15 + $0x13c] sm:$0xf0] }
 0x16c   : > { %v817_v42 = vrot.slane %v805_v34, 4  ;;  %v836_v43 = vperm.slane %v830_v38, %v2632_v24  ;;  %v820_v44 = vsel %vm615_vm2, %v805_v34, %v819_v35  ;;  %v686_v48 = vperm.slane %v682_v39, %v2623_v11  ;;  %v1886_v34 = vld [vmem:[%s2544_s15 + $0x98] sm:$0xf]  ;;  %v1874_v38 = vld [vmem:[%s2544_s15 + $0x68] sm:$0xf] }
 0x16d   : > { %v828_v47 = vperm.slane %v820_v44, %v2632_v24  ;;  %v692_v49 = vperm.slane %v688_v40, %v2623_v11  ;;  %v693_v50 = vrot.slane %v681_v37, 4  ;;  %v696_v54 = vsel %vm615_vm2, %v681_v37, %v695_v41  ;;  %v2117_v39 = vld [vmem:[%s2544_s15 + $0x7c] sm:$0xf0] }
 0x16e   : > { %v818_v51 = vsel %vm615_vm2, %v817_v42, %v799_v29  ;;  %v841_v52 = vrot.slane %v836_v43, 4  ;;  %v1935_v56 = vor.u32 %v2132_v46, %v1934_v45  ;;  %v845_v58 = vrot.slane %v840_v36, 4  ;;  %v1862_v42 = vld [vmem:[%s2544_s15 + $0x38] sm:$0xf]  ;;  %v1850_v46 = vld [vmem:[%s2544_s15 + $0x8] sm:$0xf] }
 0x16f   : > { %v824_v57 = vperm.slane %v818_v51, %v2632_v24  ;;  %v847_v59 = vrot.slane %v828_v47, 4  ;;  %v705_v60 = vrot.slane %v692_v49, 4  ;;  %v2694_v61 = vperm.slane %v696_v54, %v2632_v24  ;;  %v977_v54 = vld [vmem:[#allocation3] sm:$0xff] }
 0x170   : > { %v707_v62 = vrot.slane %v686_v48, 4  ;;  %587 = vmatpush.bf16.msra.mxu2 %v1935_v56  ;;  %v694_v5 = vsel %vm615_vm2, %v693_v50, %v675_v33  ;;  %v846_v13 = vsel %vm615_vm2, %v845_v58, %v828_v47  ;;  %v1923_v22 = vor.u32 %v2129_v8, %v1922_v7  ;;  %v2123_v33 = vld [vmem:[%s2544_s15 + $0xdc] sm:$0xf0] }
 0x171   : > { %v842_v63 = vsel %vm615_vm2, %v841_v52, %v824_v57  ;;  %v848_v0 = vsel %vm615_vm2, %v840_v36, %v847_v59  ;;  %v843_v1 = vrot.slane %v824_v57, 4  ;;  %v706_v2 = vsel %vm615_vm2, %v705_v60, %v686_v48  ;;  %v2120_v36 = vld [vmem:[%s2544_s15 + $0xac] sm:$0xf0]  ;;  %v2111_v47 = vld [vmem:[%s2544_s15 + $0x1c] sm:$0xf0] }
 0x172   : > { %v849_v3 = vpack.c.bf16 %v842_v63, %v842_v63  ;;  %v852_v4 = vpack.c.bf16 %v848_v0, %v848_v0  ;;  %v712_v6 = vperm.slane %v706_v2, %v2632_v24  ;;  %v708_v10 = vsel %vm615_vm2, %v692_v49, %v707_v62  ;;  %v423_v2 = vld [vmem:[%s2566_s9 + $0x2] ss:$0 sm:$0xff] }
 0x173   : > { %v844_v9 = vsel %vm615_vm2, %v836_v43, %v843_v1  ;;  %v723_v12 = vrot.slane %v2694_v61, 4  ;;  %v700_v20 = vperm.slane %v694_v5, %v2632_v24  ;;  %v716_v21 = vperm.slane %v708_v10, %v2632_v24  ;;  %v2114_v43 = vld [vmem:[%s2544_s15 + $0x4c] sm:$0xf0] }
 0x174   : > { %v983_v15 = vsel %vm978_vm3, %v849_v3, 0  ;;  %v1040_v16 = vsel %vm978_vm3, %v852_v4, 0  ;;  %v850_v17 = vpack.c.bf16 %v844_v9, %v844_v9  ;;  %v717_v18 = vrot.slane %v712_v6, 4  ;;  %588 = vmatpush.bf16.msra.mxu2 %v1923_v22 }
 0x175   : > { %992 = vmatpush.bf16.xpose.msra.mxu3 %v983_v15  ;;  %1049 = vmatpush.bf16.xpose.msrb.mxu0 %v1040_v16  ;;  %v851_v25 = vpack.c.bf16 %v846_v13, %v846_v13  ;;  %v724_v27 = vsel %vm615_vm2, %v716_v21, %v723_v12  ;;  %v1911_v28 = vor.u32 %v2126_v19, %v1910_v14  ;;  %v719_v40 = vrot.slane %v700_v20, 4 }
 0x176   : > { %v1002_v23 = vsel %vm978_vm3, %v850_v17, 0  ;;  %v718_v26 = vsel %vm615_vm2, %v717_v18, %v700_v20  ;;  %v728_v30 = vpack.c.bf16 %v724_v27, %v724_v27  ;;  %v1899_v35 = vor.u32 %v2123_v33, %v1898_v32 }
 0x177   : > { %v725_v29 = vpack.c.bf16 %v718_v26, %v718_v26  ;;  %v1021_v31 = vsel %vm978_vm3, %v851_v25, 0  ;;  %v1887_v37 = vor.u32 %v2120_v36, %v1886_v34  ;;  %v1875_v41 = vor.u32 %v2117_v39, %v1874_v38 }
 0x178   : > { %589 = vmatpush.bf16.msra.mxu2 %v1911_v28  ;;  %v720_v44 = vsel %vm615_vm2, %v712_v6, %v719_v40  ;;  %v1863_v45 = vor.u32 %v2114_v43, %v1862_v42  ;;  %v1851_v49 = vor.u32 %v2111_v47, %v1850_v46  ;;  %v721_v50 = vrot.slane %v716_v21, 4 }
 0x179   : > { %v726_v48 = vpack.c.bf16 %v720_v44, %v720_v44 }
 0x17a   : > { %v722_v51 = vsel %vm615_vm2, %v721_v50, %v2694_v61 }
 0x17b   : > { %v727_v52 = vpack.c.bf16 %v722_v51, %v722_v51 }
 0x17c   : > { %1936 = vmatmul.msk.bf16.vlgmr.msra.gmra.mxu3 %vm978_vm3, %v725_v29  ;;  %1939 = vmatmul.msk.bf16.vlgmr.msrb.gmra.mxu0 %vm978_vm3, %v728_v30 }
 0x17d   : > { %1011 = vmatpush.bf16.xpose.msrb.mxu3 %v1002_v23  ;;  %590 = vmatpush.bf16.msra.mxu2 %v1899_v35 }
 0x181   : > { %591 = vmatpush.bf16.msra.mxu2 %v1887_v37 }
 0x185   : > { %1030 = vmatpush.bf16.xpose.msra.mxu3 %v1021_v31  ;;  %592 = vmatpush.bf16.msra.mxu2 %v1875_v41 }
 0x189   : > { %593 = vmatpush.bf16.msra.mxu2 %v1863_v45 }
 0x18c   : > { %1937 = vmatmul.msk.bf16.vlgmr.msrb.gmra.mxu3 %vm978_vm3, %v726_v48 }
 0x18d   : > { %594 = vmatpush.bf16.msra.mxu2 %v1851_v49 }
 0x190   : > { %595 = vmatmul.bf16.vlgmr.msra.gmra.mxu2 %v2610_v55 }
 0x19c   : > { %1938 = vmatmul.msk.bf16.vlgmr.msra.gmra.mxu3 %vm978_vm3, %v727_v52 }
 0x1f9   : > { %v1051_v56 = vpop.f32.mrf.mxu0 }
 0x1fa   : > { %v1052_v57 = vadd.f32 %v1051_v56, %v977_v54 }
 0x1fc   : > { %v1065_v58 = vsel %vm1055_vm4, %v1052_v57, -inf }
 0x1fd   : > { %1066 = vmax.xlane.f32.xlu2 %v1065_v58 }
 0x1ff   : > { %v994_v59 = vpop.f32.mrf.mxu3 }
 0x200   : > { %v995_v60 = vadd.f32 %v994_v59, %v977_v54 }
 0x201   : > { %v1053_v62 = vpop.f32.mrf.mxu0 }
 0x202   : > { %v1056_v55 = vsel %vm1055_vm4, %v995_v60, -inf }
 0x203   : > { %1057 = vmax.xlane.f32.xlu0 %v1056_v55 }
 0x207   : > { %v996_v63 = vpop.f32.mrf.mxu3 }
 0x20f   : > { %v1013_v0 = vpop.f32.mrf.mxu3 }
 0x210   : > { %v1014_v61 = vadd.f32 %v1013_v0, %v977_v54 }
 0x212   : > { %v1059_v1 = vsel %vm1055_vm4, %v1014_v61, -inf }
 0x213   : > { %1060 = vmax.xlane.f32.xlu2 %v1059_v1  ;;  %v596_v3 = vpop.f32.mrf.mxu2 }
 0x214   : > { %v603_v4 = vadd.f32 %v596_v3, %v423_v2 }
 0x216   : > { %v865_v41 = vrot.slane %v603_v4, 4 }
 0x217   : > { %v1015_v5 = vpop.f32.mrf.mxu3  ;;  %854 = vrot.lane.b32.xlu0 %v603_v4, %s2427_s12 }
 0x21b   : > { %v598_v6 = vpop.f32.mrf.mxu2 }
 0x21f   : > { %v1032_v7 = vpop.f32.mrf.mxu3 }
 0x220   : > { %v1033_v8 = vadd.f32 %v1032_v7, %v977_v54 }
 0x222   : > { %v1062_v9 = vsel %vm1055_vm4, %v1033_v8, -inf }
 0x223   : > { %1063 = vmax.xlane.f32.xlu1 %v1062_v9 }
 0x227   : > { %v1034_v10 = vpop.f32.mrf.mxu3 }
 0x22b   : > { %860 = vrot.lane.b32.xlu2 %v603_v4, %s2426_s19 }
 0x23c   : > { %857 = vrot.lane.b32.xlu1 %v603_v4, %s2428_s13 }
 0x270   : > { %v1067_v12 = vpop.xlane.xlu2 %1066 }
 0x271   : > { %v1071_v15 = vsub.f32 %v1052_v57, %v1067_v12 }
 0x273   : > { %v1078_v17 = vmul.f32 1.442695, %v1071_v15 }
 0x276   : > { %v1058_v13 = vpop.xlane.xlu0 %1057 }
 0x277   : > { %v1068_v14 = vsub.f32 %v995_v60, %v1058_v13 }
 0x279   : > { %v1072_v16 = vmul.f32 1.442695, %v1068_v14 }
 0x27b   : > { %2263 = vpow2.f32 %v1072_v16 }
 0x27c   : > { %2265 = vpow2.f32 %v1078_v17 }
 0x281   : > { %v2743_v18 = vpop.eup %2263 }
 0x282   : > { %v1080_v19 = vsel %vm1055_vm4, %v2743_v18, 0.0  ;;  %v2747_v21 = vpop.eup %2265 }
 0x283   : > { %1081 = vadd.xlane.f32.xlu0 %v1080_v19  ;;  %v1089_v25 = vsel %vm1055_vm4, %v2747_v21, 0.0 }
 0x286   : > { %v1061_v20 = vpop.xlane.xlu2 %1060 }
 0x287   : > { %v1069_v22 = vsub.f32 %v1014_v61, %v1061_v20 }
 0x289   : > { %v1074_v23 = vmul.f32 1.442695, %v1069_v22  ;;  %v855_v31 = vpop.permute.xlu0 %854 }
 0x28a   : > { %v877_v35 = vrot.slane %v855_v31, 4 }
 0x28b   : > { %2267 = vpow2.f32 %v1074_v23  ;;  %1090 = vadd.xlane.f32.xlu0 %v1089_v25 }
 0x28e   : > { %v861_v34 = vpop.permute.xlu2 %860 }
 0x28f   : > { %v875_v36 = vrot.slane %v861_v34, 4  ;;  %v878_v37 = vsel %vm615_vm2, %v861_v34, %v877_v35 }
 0x290   : > { %v886_v39 = vperm.slane %v878_v37, %v2623_v11 }
 0x291   : > { %v2751_v26 = vpop.eup %2267  ;;  %v876_v38 = vsel %vm615_vm2, %v875_v36, %v855_v31 }
 0x292   : > { %v1083_v27 = vsel %vm1055_vm4, %v2751_v26, 0.0  ;;  %v882_v40 = vperm.slane %v876_v38, %v2623_v11  ;;  %v899_v42 = vrot.slane %v886_v39, 4 }
 0x293   : > { %1084 = vadd.xlane.f32.xlu2 %v1083_v27 }
 0x294   : > { %v887_v46 = vrot.slane %v882_v40, 4 }
 0x296   : > { %v1064_v28 = vpop.xlane.xlu1 %1063 }
 0x297   : > { %v1070_v29 = vsub.f32 %v1033_v8, %v1064_v28 }
 0x299   : > { %v1076_v30 = vmul.f32 1.442695, %v1070_v29 }
 0x29b   : > { %2269 = vpow2.f32 %v1076_v30 }
 0x2a1   : > { %v2755_v32 = vpop.eup %2269 }
 0x2a2   : > { %v1086_v33 = vsel %vm1055_vm4, %v2755_v32, 0.0 }
 0x2a3   : > { %1087 = vadd.xlane.f32.xlu1 %v1086_v33 }
 0x2ae   : > { %v858_v43 = vpop.permute.xlu1 %857 }
 0x2af   : > { %v863_v44 = vrot.slane %v858_v43, 4  ;;  %v866_v45 = vsel %vm615_vm2, %v858_v43, %v865_v41 }
 0x2b0   : > { %v874_v47 = vperm.slane %v866_v45, %v2623_v11 }
 0x2b1   : > { %v864_v48 = vsel %vm615_vm2, %v863_v44, %v603_v4 }
 0x2b2   : > { %v870_v49 = vperm.slane %v864_v48, %v2623_v11  ;;  %v900_v50 = vsel %vm615_vm2, %v899_v42, %v874_v47  ;;  %v901_v51 = vrot.slane %v874_v47, 4 }
 0x2b3   : > { %v906_v52 = vperm.slane %v900_v50, %v2632_v24 }
 0x2b4   : > { %v888_v54 = vsel %vm615_vm2, %v887_v46, %v870_v49  ;;  %v889_v56 = vrot.slane %v870_v49, 4  ;;  %v902_v57 = vsel %vm615_vm2, %v886_v39, %v901_v51 }
 0x2b5   : > { %v894_v58 = vperm.slane %v888_v54, %v2632_v24  ;;  %v910_v59 = vperm.slane %v902_v57, %v2632_v24  ;;  %v915_v55 = vrot.slane %v906_v52, 4 }
 0x2b6   : > { %v890_v60 = vsel %vm615_vm2, %v882_v40, %v889_v56 }
 0x2b7   : > { %v898_v62 = vperm.slane %v890_v60, %v2632_v24  ;;  %v917_v63 = vrot.slane %v910_v59, 4  ;;  %v911_v0 = vrot.slane %v894_v58, 4  ;;  %v916_v6 = vsel %vm615_vm2, 0.0, %v915_v55 }
 0x2b9   : > { %v913_v61 = vrot.slane %v898_v62, 4  ;;  %v918_v1 = vsel %vm615_vm2, 0.0, %v917_v63  ;;  %v930_v2 = vsel %vm615_vm2, %v917_v63, %v906_v52  ;;  %v912_v13 = vsel %vm615_vm2, 0.0, %v911_v0 }
 0x2ba   : > { %v934_v3 = vperm.slane %v930_v2, %v2623_v11  ;;  %v935_v4 = vrot.slane %v918_v1, 4 }
 0x2bb   : > { %v914_v5 = vsel %vm615_vm2, 0.0, %v913_v61  ;;  %v919_v7 = vsel %vm615_vm2, %v913_v61, %v894_v58 }
 0x2bc   : > { %v924_v8 = vrot.slane %v914_v5, 4  ;;  %v936_v9 = vsel %vm615_vm2, %v935_v4, %v916_v6  ;;  %v955_v10 = vrot.slane %v934_v3, 4  ;;  %v923_v12 = vperm.slane %v919_v7, %v2623_v11 }
 0x2bd   : > { %v940_v14 = vperm.slane %v936_v9, %v2623_v11 }
 0x2be   : > { %v925_v15 = vsel %vm615_vm2, %v924_v8, %v912_v13  ;;  %v943_v16 = vrot.slane %v923_v12, 4 }
 0x2bf   : > { %v929_v17 = vperm.slane %v925_v15, %v2623_v11  ;;  %v956_v19 = vsel %vm615_vm2, %v940_v14, %v955_v10  ;;  %v953_v20 = vrot.slane %v940_v14, 4 }
 0x2c0   : > { %v964_v22 = vperm.slane %v956_v19, %v2632_v24 }
 0x2c1   : > { %v944_v23 = vsel %vm615_vm2, %v929_v17, %v943_v16  ;;  %v941_v25 = vrot.slane %v929_v17, 4  ;;  %v954_v27 = vsel %vm615_vm2, %v953_v20, %v934_v3 }
 0x2c2   : > { %v952_v28 = vperm.slane %v944_v23, %v2632_v24  ;;  %v969_v29 = vrot.slane %v964_v22, 4  ;;  %v960_v30 = vperm.slane %v954_v27, %v2632_v24 }
 0x2c3   : > { %v942_v31 = vsel %vm615_vm2, %v941_v25, %v923_v12 }
 0x2c4   : > { %v970_v33 = vsel %vm615_vm2, %v969_v29, %v952_v28  ;;  %v948_v34 = vperm.slane %v942_v31, %v2632_v24  ;;  %v965_v35 = vrot.slane %v960_v30, 4  ;;  %v971_v36 = vrot.slane %v952_v28, 4 }
 0x2c5   : > { %v975_v37 = vpack.c.bf16 %v970_v33, %v970_v33 }
 0x2c6   : > { %v966_v38 = vsel %vm615_vm2, %v965_v35, %v948_v34  ;;  %v967_v39 = vrot.slane %v948_v34, 4  ;;  %v972_v40 = vsel %vm615_vm2, %v964_v22, %v971_v36 }
 0x2c7   : > { %v1147_v41 = vsel %vm1107_vm5, %v975_v37, 0  ;;  %v973_v42 = vpack.c.bf16 %v966_v38, %v966_v38  ;;  %v976_v43 = vpack.c.bf16 %v972_v40, %v972_v40 }
 0x2c8   : > { %1156 = vmatpush.bf16.msrb.mxu3 %v1147_v41  ;;  %v968_v44 = vsel %vm615_vm2, %v960_v30, %v967_v39 }
 0x2c9   : > { %v1109_v45 = vsel %vm1107_vm5, %v973_v42, 0  ;;  %v1166_v46 = vsel %vm1107_vm5, %v976_v43, 0  ;;  %v974_v47 = vpack.c.bf16 %v968_v44, %v968_v44 }
 0x2ca   : > { %1118 = vmatpush.bf16.msrb.mxu2 %v1109_v45  ;;  %1175 = vmatpush.bf16.msra.mxu0 %v1166_v46 }
 0x2cb   : > { %v1128_v48 = vsel %vm1107_vm5, %v974_v47, 0 }
 0x2ce   : > { %1137 = vmatpush.bf16.msra.mxu2 %v1128_v48 }
 0x2f6   : > { %v1082_v49 = vpop.xlane.xlu0 %1081 }
 0x2f7   : > { %2271 = vrcp.f32 %v1082_v49 }
 0x2fd   : > { %v2272_v50 = vpop.eup %2271 }
 0x2fe   : > { %v1096_v51 = vmul.f32 %v2272_v50, %v2743_v18  ;;  %v1091_v52 = vpop.xlane.xlu0 %1090 }
 0x2ff   : > { %2273 = vrcp.f32 %v1091_v52 }
 0x300   : > { %v1100_v54 = vpack.c.bf16 %v1096_v51, %v1096_v51 }
 0x302   : > { %1940 = vmatmul.msk.bf16.vlgmr.msrb.gmra.mxu2 %vm1055_vm4, %v1100_v54 }
 0x305   : > { %v2274_v56 = vpop.eup %2273 }
 0x306   : > { %v1099_v57 = vmul.f32 %v2274_v56, %v2747_v21  ;;  %v1085_v58 = vpop.xlane.xlu2 %1084 }
 0x307   : > { %2275 = vrcp.f32 %v1085_v58 }
 0x308   : > { %v1103_v59 = vpack.c.bf16 %v1099_v57, %v1099_v57 }
 0x30a   : > { %1943 = vmatmul.msk.bf16.vlgmr.msra.gmra.mxu0 %vm1055_vm4, %v1103_v59 }
 0x30d   : > { %v2276_v60 = vpop.eup %2275 }
 0x30e   : > { %v1097_v62 = vmul.f32 %v2276_v60, %v2751_v26 }
 0x310   : > { %v1101_v55 = vpack.c.bf16 %v1097_v62, %v1097_v62 }
 0x312   : > { %1941 = vmatmul.msk.bf16.vlgmr.msra.gmra.mxu2 %vm1055_vm4, %v1101_v55 }
 0x316   : > { %v1088_v18 = vpop.xlane.xlu1 %1087 }
 0x317   : > { %2277 = vrcp.f32 %v1088_v18 }
 0x31d   : > { %v2278_v63 = vpop.eup %2277 }
 0x31e   : > { %v1098_v0 = vmul.f32 %v2278_v63, %v2755_v32 }
 0x320   : > { %v1102_v61 = vpack.c.bf16 %v1098_v0, %v1098_v0 }
 0x322   : > { %1942 = vmatmul.msk.bf16.vlgmr.msrb.gmra.mxu3 %vm1055_vm4, %v1102_v61 }
 0x385   : > { %v1120_v21 = vpop.f32.mrf.mxu2 }
 0x386   : > { %v1183_v10 = vrot.slane %v1120_v21, 4 }
 0x387   : > { %v1177_v1 = vpop.f32.mrf.mxu0 }
 0x388   : > { %v1193_v7 = vrot.slane %v1177_v1, 4 }
 0x38d   : > { %v1122_v2 = vpop.f32.mrf.mxu2 }
 0x38f   : > { %v1179_v3 = vpop.f32.mrf.mxu0 }
 0x395   : > { %v1139_v4 = vpop.f32.mrf.mxu2 }
 0x396   : > { %v1195_v5 = vrot.slane %v1139_v4, 4  ;;  %v1194_v8 = vsel %vm615_vm2, %v1193_v7, %v1139_v4 }
 0x397   : > { %v1200_v32 = vperm.slane %v1194_v8, %v2623_v11  ;;  %v1970_v8 = vld [vmem:[%s2544_s15 + $0x12c] sm:$0xf] }
 0x398   : > { %v1196_v26 = vsel %vm615_vm2, %v1177_v1, %v1195_v5 }
 0x399   : > { %v1204_v9 = vperm.slane %v1196_v26, %v2623_v11  ;;  %v1205_v19 = vrot.slane %v1200_v32, 4  ;;  %v2140_v26 = vld [vmem:[%s2544_s15 + $0x170] sm:$0xf0] }
 0x39b   : > { %v1217_v15 = vrot.slane %v1204_v9, 4 }
 0x39d   : > { %v1141_v6 = vpop.f32.mrf.mxu2 }
 0x3a5   : > { %v1158_v12 = vpop.f32.mrf.mxu3 }
 0x3a6   : > { %v1181_v13 = vrot.slane %v1158_v12, 4  ;;  %v1184_v14 = vsel %vm615_vm2, %v1158_v12, %v1183_v10  ;;  %v2139_v10 = vld [vmem:[%s2544_s15 + $0x140] sm:$0xf0]  ;;  %v1966_v12 = vld [vmem:[%s2544_s15 + $0xfc] sm:$0xf] }
 0x3a7   : > { %v1192_v16 = vperm.slane %v1184_v14, %v2623_v11 }
 0x3a8   : > { %v1182_v17 = vsel %vm615_vm2, %v1181_v13, %v1120_v21  ;;  %v2138_v13 = vld [vmem:[%s2544_s15 + $0x110] sm:$0xf0] }
 0x3a9   : > { %v1188_v20 = vperm.slane %v1182_v17, %v2623_v11  ;;  %v1218_v22 = vsel %vm615_vm2, %v1217_v15, %v1192_v16  ;;  %v1219_v23 = vrot.slane %v1192_v16, 4  ;;  %v1967_v14 = vor.u32 %v2138_v13, %v1966_v12  ;;  %v1962_v15 = vld [vmem:[%s2544_s15 + $0xcc] sm:$0xf]  ;;  %v2137_v16 = vld [vmem:[%s2544_s15 + $0xe0] sm:$0xf0] }
 0x3aa   : > { %v1224_v25 = vperm.slane %v1218_v22, %v2632_v24  ;;  %v1963_v17 = vor.u32 %v2137_v16, %v1962_v15  ;;  %v2012_v12 = vld [vmem:[%s2544_s15 + $0xe8] sm:$0xf0]  ;;  %v2002_v15 = vld [vmem:[%s2544_s15 + $0xa0] sm:$0xf]  ;;  %v2148_v16 = vld [vmem:[%s2544_s15 + $0xb4] sm:$0xf0] }
 0x3ab   : > { %v1206_v27 = vsel %vm615_vm2, %v1205_v19, %v1188_v20  ;;  %v1207_v28 = vrot.slane %v1188_v20, 4  ;;  %v1220_v29 = vsel %vm615_vm2, %v1204_v9, %v1219_v23  ;;  %v1958_v19 = vld [vmem:[%s2544_s15 + $0x9c] sm:$0xf]  ;;  %v2136_v20 = vld [vmem:[%s2544_s15 + $0xb0] sm:$0xf0] }
 0x3ac   : > { %v1212_v30 = vperm.slane %v1206_v27, %v2632_v24  ;;  %v1228_v31 = vperm.slane %v1220_v29, %v2632_v24  ;;  %v1233_v36 = vrot.slane %v1224_v25, 4  ;;  %v1959_v22 = vor.u32 %v2136_v20, %v1958_v19  ;;  %v1954_v23 = vld [vmem:[%s2544_s15 + $0x6c] sm:$0xf]  ;;  %v2134_v29 = vld [vmem:[%s2544_s15 + $0x50] sm:$0xf0] }
 0x3ad   : > { %v1208_v33 = vsel %vm615_vm2, %v1200_v32, %v1207_v28  ;;  %v1160_v34 = vpop.f32.mrf.mxu3  ;;  %v1971_v32 = vor.u32 %v2139_v10, %v1970_v8  ;;  %v1950_v28 = vld [vmem:[%s2544_s15 + $0x3c] sm:$0xf]  ;;  %v2150_v10 = vld [vmem:[%s2544_s15 + $0xe4] sm:$0xf0] }
 0x3ae   : > { %v1216_v35 = vperm.slane %v1208_v33, %v2632_v24  ;;  %v1235_v37 = vrot.slane %v1228_v31, 4  ;;  %v1229_v38 = vrot.slane %v1212_v30, 4  ;;  %v1234_v45 = vsel %vm615_vm2, 0.0, %v1233_v36  ;;  %v1946_v31 = vld [vmem:[%s2544_s15 + $0xc] sm:$0xf] }
 0x3af   : > { %v2133_v33 = vld [vmem:[%s2544_s15 + $0x20] sm:$0xf0]  ;;  %v2004_v19 = vld [vmem:[%s2544_s15 + $0xb8] sm:$0xf0] }
 0x3b0   : > { %v1231_v39 = vrot.slane %v1216_v35, 4  ;;  %v1236_v40 = vsel %vm615_vm2, 0.0, %v1235_v37  ;;  %v1248_v41 = vsel %vm615_vm2, %v1235_v37, %v1224_v25  ;;  %v1230_v51 = vsel %vm615_vm2, 0.0, %v1229_v38  ;;  %v2135_v25 = vld [vmem:[%s2544_s15 + $0x80] sm:$0xf0] }
 0x3b1   : > { %v1252_v42 = vperm.slane %v1248_v41, %v2623_v11  ;;  %v1253_v43 = vrot.slane %v1236_v40, 4  ;;  %v1955_v27 = vor.u32 %v2135_v25, %v1954_v23  ;;  %v1947_v34 = vor.u32 %v2133_v33, %v1946_v31 }
 0x3b2   : > { %v1232_v44 = vsel %vm615_vm2, 0.0, %v1231_v39  ;;  %v1237_v46 = vsel %vm615_vm2, %v1231_v39, %v1212_v30  ;;  %v1951_v30 = vor.u32 %v2134_v29, %v1950_v28  ;;  %v2146_v28 = vld [vmem:[%s2544_s15 + $0x84] sm:$0xf0]  ;;  %v2145_v29 = vld [vmem:[%s2544_s15 + $0x74] sm:$0xf] }
 0x3b3   : > { %v1254_v47 = vsel %vm615_vm2, %v1253_v43, %v1234_v45  ;;  %v1241_v48 = vperm.slane %v1237_v46, %v2623_v11  ;;  %v1242_v49 = vrot.slane %v1232_v44, 4  ;;  %v1273_v50 = vrot.slane %v1252_v42, 4 }
 0x3b4   : > { %v1258_v52 = vperm.slane %v1254_v47, %v2623_v11  ;;  %v2431_v47 = vmov 128.0  }
 0x3b5   : > { %v1243_v54 = vsel %vm615_vm2, %v1242_v49, %v1230_v51  ;;  %v1261_v56 = vrot.slane %v1241_v48, 4  ;;  %2279 = vrcp.f32 %v2431_v47  ;;  %v1980_v47 = vld [vmem:[%s2544_s15 + $0x28] sm:$0xf0] }
 0x3b6   : > { %v1247_v57 = vperm.slane %v1243_v54, %v2623_v11  ;;  %v1274_v58 = vsel %vm615_vm2, %v1258_v52, %v1273_v50  ;;  %v1271_v59 = vrot.slane %v1258_v52, 4 }
 0x3b7   : > { %v1282_v60 = vperm.slane %v1274_v58, %v2632_v24 }
 0x3b8   : > { %v1262_v62 = vsel %vm615_vm2, %v1247_v57, %v1261_v56  ;;  %v1259_v55 = vrot.slane %v1247_v57, 4  ;;  %v1272_v18 = vsel %vm615_vm2, %v1271_v59, %v1252_v42  ;;  %v424_v42 = vld [vmem:[%s2566_s9 + $0x3] ss:$0 sm:$0xff]  ;;  %v2034_v59 = vld [vmem:[%s2544_s15 + $0x160] sm:$0xf] }
 0x3b9   : > { %v1270_v63 = vperm.slane %v1262_v62, %v2632_v24  ;;  %v1287_v0 = vrot.slane %v1282_v60, 4  ;;  %v1278_v61 = vperm.slane %v1272_v18, %v2632_v24  ;;  %v2155_v62 = vld [vmem:[%s2544_s15 + $0x164] sm:$0xf]  ;;  %v2036_v18 = vld [vmem:[%s2544_s15 + $0x178] sm:$0xf0] }
 0x3ba   : > { %v1260_v11 = vsel %vm615_vm2, %v1259_v55, %v1241_v48 }
 0x3bb   : > { %v1288_v21 = vsel %vm615_vm2, %v1287_v0, %v1270_v63  ;;  %v1289_v1 = vrot.slane %v1270_v63, 4  ;;  %v1266_v2 = vperm.slane %v1260_v11, %v2632_v24  ;;  %v1283_v3 = vrot.slane %v1278_v61, 4  ;;  %v1974_v24 = vld [vmem:[%s2544_s15 + $0x15c] sm:$0xf]  ;;  %v2280_v48 = vpop.eup %2279  ;;  %v2026_v63 = vld [vmem:[%s2544_s15 + $0x130] sm:$0xf] }
 0x3bc   : > { %1296 = vrot.lane.b32.xlu0 %v1288_v21, %s2428_s13  ;;  %v1975_v9 = vor.u32 %v2140_v26, %v1974_v24  ;;  %v1374_v49 = vmul.f32 128.0, %v2280_v48  ;;  %vm1378_vm8 = vweird.f32 %v2280_v48  ;;  %v2154_v0 = vld [vmem:[%s2544_s15 + $0x144] sm:$0xf0]  ;;  %v2153_v11 = vld [vmem:[%s2544_s15 + $0x134] sm:$0xf] }
 0x3bd   : > { %v1290_v4 = vsel %vm615_vm2, %v1282_v60, %v1289_v1  ;;  %v1285_v5 = vrot.slane %v1266_v2, 4  ;;  %v1284_v6 = vsel %vm615_vm2, %v1283_v3, %v1266_v2  ;;  %v2156_v60 = vld [vmem:[%s2544_s15 + $0x174] sm:$0xf0]  ;;  %v2028_v21 = vld [vmem:[%s2544_s15 + $0x148] sm:$0xf0]  ;;  %v2027_v1 = vor.u32 %v2154_v0, %v2026_v63  ;;  %v2161_v63 = vld [vmem:[%s2550_s23 + $0x20] sm:$0xff] }
 0x3be   : > { %1300 = vrot.lane.b32.xlu2 %v1290_v4, %s2427_s12  ;;  %1357 = vmatpush.bf16.msrb.mxu1 %v1975_v9  ;;  %v1375_v50 = vsub.f32 1.0, %v1374_v49  ;;  %v2035_v55 = vor.u32 %v2156_v60, %v2034_v59  ;;  %v2031_v2 = vor.u32 %v2153_v11, %v2028_v21  ;;  %v2018_v3 = vld [vmem:[%s2544_s15 + $0x100] sm:$0xf]  ;;  %v2152_v4 = vld [vmem:[%s2544_s15 + $0x114] sm:$0xf0]  ;;  %v2171_v59 = vld [vmem:[%s2550_s23 + $0x70] sm:$0xff] }
 0x3bf   : > { %v1286_v7 = vsel %vm615_vm2, %v1278_v61, %v1285_v5  ;;  %v2039_v61 = vor.u32 %v2155_v62, %v2036_v18  ;;  %v2151_v5 = vld [vmem:[%s2544_s15 + $0x104] sm:$0xf]  ;;  %v2019_v26 = vor.u32 %v2152_v4, %v2018_v3  ;;  %v2010_v9 = vld [vmem:[%s2544_s15 + $0xd0] sm:$0xf]  ;;  %v2172_v49 = vld [vmem:[%s2550_s23 + $0x78] sm:$0xff] }
 0x3c0   : > { %1292 = vrot.lane.b32.xlu1 %v1286_v7, %s2426_s19  ;;  %v1376_v51 = vmul.f32 %v2280_v48, %v1375_v50  ;;  %1503 = vmatpush.bf16.msrb.mxu2 %v2035_v55  ;;  %v2011_v13 = vor.u32 %v2150_v10, %v2010_v9  ;;  %v2162_v55 = vld [vmem:[%s2550_s23 + $0x28] sm:$0xff]  ;;  %v2169_v0 = vld [vmem:[%s2550_s23 + $0x60] sm:$0xff]  ;;  %v2160_v21 = vld [vmem:[%s2550_s23 + $0x18] sm:$0xff] }
 0x3c1   : > { %1516 = vmatpush.bf16.msra.mxu3 %v2039_v61  ;;  %v2170_v18 = vld [vmem:[%s2550_s23 + $0x68] sm:$0xff]  ;;  %v428_v9 = vld [vmem:[%s2566_s9 + $0x6] ss:$0 sm:$0xff] }
 0x3c2   : > { %1358 = vmatpush.bf16.msrb.mxu1 %v1971_v32  ;;  %v1377_v52 = vadd.f32 %v2280_v48, %v1376_v51  ;;  %v2149_v32 = vld [vmem:[%s2544_s15 + $0xd4] sm:$0xf] }
 0x3c4   : > { %v2873_v54 = vsel %vm1378_vm8, %v2280_v48, %v1377_v52  ;;  %1504 = vmatpush.bf16.msrb.mxu2 %v2027_v1  ;;  %v2164_v48 = vld [vmem:[%s2550_s23 + $0x38] sm:$0xff] }
 0x3c5   : > { %1517 = vmatpush.bf16.msra.mxu3 %v2031_v2  ;;  %1629 = vmatpush.bf16.msrb.mxu0 %v2164_v48  ;;  %v2168_v1 = vld [vmem:[%s2550_s23 + $0x58] sm:$0xff] }
 0x3c6   : > { %1359 = vmatpush.bf16.msrb.mxu1 %v1967_v14  ;;  %v2015_v14 = vor.u32 %v2149_v32, %v2012_v12  ;;  %v429_v12 = vld [vmem:[%s2566_s9 + $0x7] ss:$0 sm:$0xff] }
 0x3c8   : > { %1505 = vmatpush.bf16.msrb.mxu2 %v2019_v26 }
 0x3ca   : > { %1360 = vmatpush.bf16.msrb.mxu1 %v1963_v17  ;;  %v2147_v17 = vld [vmem:[%s2544_s15 + $0xa4] sm:$0xf] }
 0x3cb   : > { %v2007_v25 = vor.u32 %v2147_v17, %v2004_v19  ;;  %v2166_v17 = vld [vmem:[%s2550_s23 + $0x48] sm:$0xff]  ;;  %v2157_v19 = vld [vmem:[%s2550_s23] sm:$0xff] }
 0x3cc   : > { %1506 = vmatpush.bf16.msrb.mxu2 %v2011_v13 }
 0x3ce   : > { %1361 = vmatpush.bf16.msrb.mxu1 %v1959_v22  ;;  %v2003_v22 = vor.u32 %v2148_v16, %v2002_v15  ;;  %v2158_v16 = vld [vmem:[%s2550_s23 + $0x8] sm:$0xff] }
 0x3d0   : > { %1507 = vmatpush.bf16.msrb.mxu2 %v2003_v22  ;;  %v1839_v22 = vld [vmem:[%s2566_s9 + $0x4] ss:$8 sm:$0x3] }
 0x3d2   : > { %1362 = vmatpush.bf16.msrb.mxu1 %v1955_v27  ;;  %v1994_v27 = vld [vmem:[%s2544_s15 + $0x70] sm:$0xf] }
 0x3d3   : > { %v1995_v33 = vor.u32 %v2146_v28, %v1994_v27 }
 0x3d5   : > { %1508 = vmatpush.bf16.msrb.mxu2 %v1995_v33 }
 0x3d6   : > { %1363 = vmatpush.bf16.msrb.mxu1 %v1951_v30  ;;  %v1996_v30 = vld [vmem:[%s2544_s15 + $0x88] sm:$0xf0] }
 0x3da   : > { %1364 = vmatpush.bf16.msrb.mxu1 %v1947_v34 }
 0x3de   : > { %1642 = vmatpush.bf16.msra.mxu1 %v2172_v49 }
 0x3e2   : > { %1643 = vmatpush.bf16.msra.mxu1 %v2171_v59 }
 0x3e6   : > { %1644 = vmatpush.bf16.msra.mxu1 %v2170_v18 }
 0x3ea   : > { %1645 = vmatpush.bf16.msra.mxu1 %v2169_v0 }
 0x3ee   : > { %1646 = vmatpush.bf16.msra.mxu1 %v2168_v1 }
 0x418   : > { %v1301_v38 = vpop.permute.xlu2 %1300 }
 0x42e   : > { %v1297_v36 = vpop.permute.xlu0 %1296 }
 0x432   : > { %v1293_v35 = vpop.permute.xlu1 %1292 }
 0x433   : > { %v1303_v37 = vsel %vm978_vm3, %v1284_v6, %v1293_v35  ;;  %v2020_v6 = vld [vmem:[%s2544_s15 + $0x118] sm:$0xf0]  ;;  %v1999_v35 = vor.u32 %v2145_v29, %v1996_v30 }
 0x434   : > { %v1305_v39 = vsel %vm1304_vm6, %v1303_v37, %v1297_v36  ;;  %v2023_v8 = vor.u32 %v2151_v5, %v2020_v6  ;;  %v1986_v36 = vld [vmem:[%s2544_s15 + $0x40] sm:$0xf]  ;;  %v2144_v37 = vld [vmem:[%s2544_s15 + $0x54] sm:$0xf0]  ;;  %v2159_v6 = vld [vmem:[%s2550_s23 + $0x10] sm:$0xff] }
 0x435   : > { %v1307_v40 = vsel %vm1306_vm7, %v1305_v39, %v1301_v38  ;;  %v2143_v38 = vld [vmem:[%s2544_s15 + $0x44] sm:$0xf]  ;;  %v1988_v39 = vld [vmem:[%s2544_s15 + $0x58] sm:$0xf0] }
 0x436   : > { %v1308_v41 = vpack.c.bf16 %v1307_v40, %v1307_v40  ;;  %1518 = vmatpush.bf16.msra.mxu3 %v2023_v8 }
 0x438   : > { %1365 = vmatmul.bf16.vlgmr.msrb.gmra.mxu1 %v1308_v41  ;;  %v1987_v41 = vor.u32 %v2144_v37, %v1986_v36  ;;  %v427_v37 = vld [vmem:[%s2566_s9 + $0x5] ss:$0 sm:$0xff] }
 0x43a   : > { %1519 = vmatpush.bf16.msra.mxu3 %v2015_v14  ;;  %1509 = vmatpush.bf16.msrb.mxu2 %v1987_v41 }
 0x43e   : > { %1520 = vmatpush.bf16.msra.mxu3 %v2007_v25  ;;  %v1420_v25 = vperm.slane %v1839_v22, 1 }
 0x442   : > { %1521 = vmatpush.bf16.msra.mxu3 %v1999_v35 }
 0x4b5   : > { %v1366_v43 = vpop.f32.mrf.mxu1 }
 0x4b6   : > { %v1367_v44 = vadd.f32 %v1366_v43, %v424_v42  ;;  %v1991_v43 = vor.u32 %v2143_v38, %v1988_v39 }
 0x4b8   : > { %v1370_v45 = vadd.f32 %v1367_v44, %v2606_v53  ;;  %v1978_v44 = vld [vmem:[%s2544_s15 + $0x10] sm:$0xf]  ;;  %1522 = vmatpush.bf16.msra.mxu3 %v1991_v43 }
 0x4ba   : > { %1371 = vadd.xlane.f32.xlu0 %v1370_v45 }
 0x4bd   : > { %v1368_v46 = vpop.f32.mrf.mxu1 }
 0x4be   : > { %v2141_v46 = vld [vmem:[%s2544_s15 + $0x14] sm:$0xf] }
 0x52d   : > { %v1372_v53 = vpop.xlane.xlu0 %1371 }
 0x52e   : > { %v1380_v56 = vmul.f32 %v2873_v54, %v1372_v53  ;;  %v2163_v53 = vld [vmem:[%s2550_s23 + $0x30] sm:$0xff] }
 0x52f   : > { %1630 = vmatpush.bf16.msrb.mxu0 %v2163_v53 }
 0x530   : > { %v2876_v57 = vsub.f32 %v1370_v45, %v1380_v56  ;;  %v2142_v45 = vld [vmem:[%s2544_s15 + $0x24] sm:$0xf0] }
 0x531   : > { %v1979_v52 = vor.u32 %v2142_v45, %v1978_v44 }
 0x532   : > { %v1382_v58 = vmul.f32 %v2876_v57, %v2876_v57 }
 0x533   : > { %1510 = vmatpush.bf16.msrb.mxu2 %v1979_v52  ;;  %1631 = vmatpush.bf16.msrb.mxu0 %v2162_v55 }
 0x534   : > { %1383 = vadd.xlane.f32.xlu1 %v1382_v58  ;;  %v1983_v58 = vor.u32 %v2141_v46, %v1980_v47 }
 0x536   : > { %1523 = vmatpush.bf16.msra.mxu3 %v1983_v58 }
 0x537   : > { %1632 = vmatpush.bf16.msrb.mxu0 %v2161_v63 }
 0x53b   : > { %1633 = vmatpush.bf16.msrb.mxu0 %v2160_v21 }
 0x53f   : > { %1634 = vmatpush.bf16.msrb.mxu0 %v2159_v6 }
 0x543   : > { %1635 = vmatpush.bf16.msrb.mxu0 %v2158_v16 }
 0x547   : > { %1636 = vmatpush.bf16.msrb.mxu0 %v2157_v19 }
 0x5a7   : > { %v1384_v7 = vpop.xlane.xlu1 %1383 }
 0x5a8   : > { %v2892_v24 = vmul.f32 0.007874016, %v1384_v7  ;;  %v2167_v7 = vld [vmem:[%s2550_s23 + $0x50] sm:$0xff] }
 0x5a9   : > { %1647 = vmatpush.bf16.msra.mxu1 %v2167_v7 }
 0x5aa   : > { %2281 = vrsqrt.f32 %v2892_v24  ;;  %vm1393_vm9 = vcmp.eq.f32.partialorder %v2892_v24, inf  ;;  %v1396_v51 = vand.u32 2147483648, %v2892_v24  ;;  %vm1395_vm10 = vcmp.eq.f32.partialorder %v2892_v24, 0.0 }
 0x5ad   : > { %1648 = vmatpush.bf16.msra.mxu1 %v2166_v17 }
 0x5b0   : > { %v2282_v20 = vpop.eup %2281 }
 0x5b1   : > { %v1387_v23 = vmul.f32 %v2282_v20, %v2892_v24 }
 0x5b3   : > { %v1388_v31 = vmul.f32 %v2282_v20, %v1387_v23  ;;  %v1419_v23 = vperm.slane %v1839_v22, 0 }
 0x5b5   : > { %v1389_v34 = vmul.f32 0.5, %v1388_v31 }
 0x5b7   : > { %v1390_v40 = vsub.f32 1.5, %v1389_v34 }
 0x5b9   : > { %v1391_v42 = vmul.f32 %v2282_v20, %v1390_v40  ;;  %v2165_v20 = vld [vmem:[%s2550_s23 + $0x40] sm:$0xff] }
 0x5ba   : > { %1649 = vmatpush.bf16.msra.mxu1 %v2165_v20 }
 0x5bb   : > { %v1392_v50 = vmul.f32 %v1391_v42, %v2892_v24 }
 0x5bd   : > { %v1394_v56 = vsel %vm1393_vm9, %v2892_v24, %v1392_v50 }
 0x5be   : > { %v1397_v60 = vsel %vm1395_vm10, %v1396_v51, %v1394_v56 }
 0x5bf   : > { %v1398_v62 = vadd.f32 1e-06, %v1397_v60 }
 0x5c1   : > { %2283 = vrcp.f32 %v1398_v62  ;;  %v1410_v3 = vand.u32 2147483648, %v1398_v62  ;;  %v1408_v5 = vand.u32 2147483647, %v1398_v62  ;;  %vm1404_vm12 = vweird.f32 %v1398_v62 }
 0x5c3   : > { %v1411_v26 = vor.u32 1.1754944e-38, %v1410_v3  ;;  %vm1409_vm14 = vcmp.eq.f32.partialorder %v1408_v5, 8.507059e+37  ;;  %v430_v5 = vld [vmem:[%s2566_s9 + $0x10] ss:$0 sm:$0xff] }
 0x5c7   : > { %v2284_v61 = vpop.eup %2283 }
 0x5c8   : > { %v1400_v11 = vmul.f32 %v2284_v61, %v1398_v62  ;;  %vm1405_vm11 = vweird.f32 %v2284_v61 }
 0x5c9   : > { %vm1406_vm13 = vmor %vm1404_vm12, %vm1405_vm11 }
 0x5ca   : > { %v1401_v2 = vsub.f32 1.0, %v1400_v11 }
 0x5cc   : > { %v1402_v4 = vmul.f32 %v2284_v61, %v1401_v2 }
 0x5ce   : > { %v1403_v24 = vadd.f32 %v2284_v61, %v1402_v4 }
 0x5d0   : > { %v1407_v8 = vsel %vm1406_vm13, %v2284_v61, %v1403_v24  ;;  %v431_v24 = vld [vmem:[%s2566_s9 + $0x11] ss:$0 sm:$0xff] }
 0x5d1   : > { %v1412_v10 = vsel %vm1409_vm14, %v1411_v26, %v1407_v8 }
 0x5d2   : > { %v1414_v32 = vmul.f32 %v1412_v10, %v2876_v57 }
 0x5d4   : > { %v1415_v13 = vmul.f32 %v1414_v32, %v428_v9 }
 0x5d6   : > { %v1416_v14 = vadd.f32 %v1415_v13, %v429_v12 }
 0x5d8   : > { %v1417_v15 = vpack.c.bf16 %v1416_v14, %v1416_v14 }
 0x5da   : > { %1511 = vmatmul.bf16.vlgmr.msrb.gmra.mxu2 %v1417_v15  ;;  %1524 = vmatmul.bf16.vlgmr.msra.gmra.mxu3 %v1417_v15 }
 0x65d   : > { %v1512_v27 = vpop.f32.mrf.mxu2  ;;  %v1525_v57 = vpop.f32.mrf.mxu3 }
 0x65e   : > { %v1513_v28 = vadd.f32 %v1512_v27, %v1419_v23  ;;  %v1526_v29 = vadd.f32 %v1525_v57, %v1420_v25 }
 0x660   : > { %v1529_v30 = vmax.f32 %v1513_v28, 0.0  ;;  %v1530_v31 = vmax.f32 %v1526_v29, 0.0 }
 0x662   : > { %v1531_v33 = vpack.c.bf16 %v1529_v30, %v1529_v30  ;;  %v1532_v34 = vpack.c.bf16 %v1530_v31, %v1530_v31 }
 0x664   : > { %1637 = vmatmul.bf16.vlgmr.msrb.gmra.mxu0 %v1531_v33  ;;  %1650 = vmatmul.bf16.vlgmr.msra.gmra.mxu1 %v1532_v34 }
 0x665   : > { %v1514_v35 = vpop.f32.mrf.mxu2  ;;  %v1527_v36 = vpop.f32.mrf.mxu3 }
 0x6e1   : > { %v1638_v38 = vpop.f32.mrf.mxu0  ;;  %v1651_v39 = vpop.f32.mrf.mxu1 }
 0x6e2   : > { %v1639_v40 = vadd.f32 %v1638_v38, %v427_v37 }
 0x6e4   : > { %v1652_v41 = vadd.f32 %v1651_v39, %v1639_v40 }
 0x6e6   : > { %v1655_v42 = vadd.f32 %v1652_v41, %v1416_v14 }
 0x6e8   : > { %1656 = vadd.xlane.f32.xlu2 %v1655_v42 }
 0x6e9   : > { %v1640_v43 = vpop.f32.mrf.mxu0  ;;  %v1653_v44 = vpop.f32.mrf.mxu1 }
 0x75b   : > { %v1657_v45 = vpop.xlane.xlu2 %1656 }
 0x75c   : > { %v1658_v46 = vmul.f32 %v1657_v45, %v2873_v54 }
 0x75e   : > { %v1659_v47 = vsub.f32 %v1655_v42, %v1658_v46 }
 0x760   : > { %v1660_v48 = vmul.f32 %v1659_v47, %v1659_v47 }
 0x762   : > { %1661 = vadd.xlane.f32.xlu0 %v1660_v48 }
 0x7d5   : > { %v1662_v49 = vpop.xlane.xlu0 %1661 }
 0x7d6   : > { %v1663_v50 = vmul.f32 0.007874016, %v1662_v49 }
 0x7d8   : > { %2285 = vrsqrt.f32 %v1663_v50  ;;  %vm1671_vm15 = vcmp.eq.f32.partialorder %v1663_v50, inf  ;;  %v1674_v62 = vand.u32 2147483648, %v1663_v50  ;;  %vm1673_vm0 = vcmp.eq.f32.partialorder %v1663_v50, 0.0 }
 0x7de   : > { %v2286_v51 = vpop.eup %2285 }
 0x7df   : > { %v1665_v52 = vmul.f32 %v2286_v51, %v1663_v50 }
 0x7e1   : > { %v1666_v53 = vmul.f32 %v2286_v51, %v1665_v52 }
 0x7e3   : > { %v1667_v56 = vmul.f32 0.5, %v1666_v53 }
 0x7e5   : > { %v1668_v58 = vsub.f32 1.5, %v1667_v56 }
 0x7e7   : > { %v1669_v59 = vmul.f32 %v2286_v51, %v1668_v58 }
 0x7e9   : > { %v1670_v60 = vmul.f32 %v1669_v59, %v1663_v50 }
 0x7eb   : > { %v1672_v55 = vsel %vm1671_vm15, %v1663_v50, %v1670_v60 }
 0x7ec   : > { %v1675_v18 = vsel %vm1673_vm0, %v1674_v62, %v1672_v55 }
 0x7ed   : > { %v1676_v54 = vadd.f32 1e-06, %v1675_v18 }
 0x7ef   : > { %2287 = vrcp.f32 %v1676_v54  ;;  %v1688_v11 = vand.u32 2147483648, %v1676_v54  ;;  %v1686_v1 = vand.u32 2147483647, %v1676_v54  ;;  %vm1682_vm2 = vweird.f32 %v1676_v54 }
 0x7f1   : > { %v1689_v3 = vor.u32 1.1754944e-38, %v1688_v11  ;;  %vm1687_vm4 = vcmp.eq.f32.partialorder %v1686_v1, 8.507059e+37 }
 0x7f5   : > { %v2288_v63 = vpop.eup %2287 }
 0x7f6   : > { %v1678_v0 = vmul.f32 %v2288_v63, %v1676_v54  ;;  %vm1683_vm1 = vweird.f32 %v2288_v63 }
 0x7f7   : > { %vm1684_vm3 = vmor %vm1682_vm2, %vm1683_vm1 }
 0x7f8   : > { %v1679_v61 = vsub.f32 1.0, %v1678_v0 }
 0x7fa   : > { %v1680_v21 = vmul.f32 %v2288_v63, %v1679_v61 }
 0x7fc   : > { %v1681_v2 = vadd.f32 %v2288_v63, %v1680_v21 }
 0x7fe   : > { %v1685_v4 = vsel %vm1684_vm3, %v2288_v63, %v1681_v2 }
 0x7ff   : > { %v1690_v6 = vsel %vm1687_vm4, %v1689_v3, %v1685_v4 }
 0x800   : > { %v1692_v7 = vmul.f32 %v1690_v6, %v1659_v47 }
 0x802   : > { %v1693_v26 = vmul.f32 %v1692_v7, %v430_v5  ;;  %1699 = sbr.rel (%p2104_p3) target bundleno = 2056 (0x808), region = 52 }
 0x804   : > { %v1694_v8 = vadd.f32 %v1693_v26, %v431_v24 }
 0x806   : > { %1695 = vst [vmem:[#allocation2] sm:$0xff] %v1694_v8 }
 0x807   : > { %1700 = vst [vmem:[%s2571_s11] sm:$0xff] %v1694_v8 }
 0x808 PF: > { %s20_s22 = sadd.s32 1, %s2419_s22   ;;  %s2983_s14 = sld [smem:[#allocation10_spill]] }
 0x809   : > { %p17_p4 = scmp.ge.s32.totalorder %s20_s22, 6   ;;  %s2984_s25 = sld [smem:[#allocation11_spill]] }
 0x80a   : > { %s2985_s15 = smov %s2395_s16  ;;  %s2986_s16 = smov %s2399_s17 }
 0x80b   : > { %s2987_s17 = smov %s2511_s28  ;;  %s2988_s18 = smov %s2411_s20 }
 0x80c   : > { %s2989_s19 = smov %s2415_s21  ;;  %19 = sbr.rel (!%p17_p4) target bundleno = 9 (0x9), region = 104 }
 0x80e   : > { %s2990_s20 = smov %s2983_s14 }
 0x80f   : > { %s2991_s21 = smov %s2984_s25 }
 0x811   :  { %1720 = vsyncpa [#allocation5], 1 }
 0x812   :  { %1722 = vsyncpa [#allocation5 + $0x1], 1 }
 0x813   :  { %1723 = vsyncpa [#allocation7], 1 }
 0x814   :  { %1725 = vsyncpa [#allocation7 + $0x1], 1 }

</bundles_post_ra>
